<compile_context>
chip_gen: v5e
topology: v5e:2x2
jax: 0.10.0
libtpu: 0.0.40
codegen_flags: <defaults>
</compile_context>

<pallas_src>
import math

import jax
import jax.numpy as jnp
from jax import lax
from jax.experimental import pallas as pl
from jax.experimental.pallas import tpu as pltpu


# -----------------------------------------------------------------------------
# Fused dense-layer kernel
# -----------------------------------------------------------------------------
def _dense_layer_kernel(x_ref, s1_ref, b1_ref, w1_ref, s2_ref, b2_ref, w2_ref,
                        o_ref, bott_ref):
    """One _DenseLayer, fully fused.

    x_ref   : (1, H, W, C_total) full feature buffer for this batch item
    s1/b1   : (1, C_total)       folded BN1 (zero-padded past the live channel prefix)
    w1      : (C_total, c_mid)   1x1 conv weight (zero rows past the live prefix)
    s2/b2   : (1, c_mid)         folded BN2
    w2      : (3, 3, c_mid, c_out) 3x3 conv weight, HWIO
    o_ref   : (1, TH, W, c_out)  new features for output rows [j*TH, (j+1)*TH)
    bott_ref: (TH+2, W+2, c_mid) VMEM scratch: zero-padded, activated bottleneck tile
    """
    h_idx = pl.program_id(1)
    n_h = pl.num_programs(1)
    _, _, w, c_total = x_ref.shape
    th = o_ref.shape[1]
    c_mid = w1_ref.shape[1]
    c_out = o_ref.shape[-1]

    s1 = s1_ref[...]
    b1 = b1_ref[...]
    w1 = w1_ref[...]
    s2 = s2_ref[...]
    b2 = b2_ref[...]

    def bottleneck(rows):  # (R, C_total) -> (R, c_mid): relu(bn2(conv1(relu(bn1(x)))))
        a = jnp.maximum(rows * s1 + b1, 0.0)
        # TODO(synk): cast a / w1 to bf16 for production channel widths (keep f32
        # accumulation); kept f32 here to stay within the 2e-3 reference check.
        z = jnp.dot(a, w1, preferred_element_type=jnp.float32)
        return jnp.maximum(z * s2 + b2, 0.0)

    # Zero the scratch: its 1-element border is exactly conv2's zero padding,
    # applied AFTER relu2(bn2(.)) just like the PyTorch module.
    bott_ref[...] = jnp.zeros(bott_ref.shape, bott_ref.dtype)

    r0 = pl.multiple_of(h_idx * th, th)
    core = x_ref[0, pl.ds(r0, th), :, :].reshape(th * w, c_total)
    bott_ref[1:th + 1, 1:w + 1, :] = bottleneck(core).reshape(th, w, c_mid)

    @pl.when(h_idx > 0)
    def _():  # top halo row (row r0 - 1); first tile keeps the zero image border
        row = x_ref[0, pl.ds(r0 - 1, 1), :, :].reshape(w, c_total)
        bott_ref[0:1, 1:w + 1, :] = bottleneck(row).reshape(1, w, c_mid)

    @pl.when(h_idx < n_h - 1)
    def _():  # bottom halo row (row r0 + TH); last tile keeps the zero image border
        row = x_ref[0, pl.ds(r0 + th, 1), :, :].reshape(w, c_total)
        bott_ref[th + 1:th + 2, 1:w + 1, :] = bottleneck(row).reshape(1, w, c_mid)

    # 3x3 conv = 9 MXU matmuls over 3 W-shifted bands of the padded bottleneck
    # (3 materialized shifts instead of 9 strided window copies).
    bott = bott_ref[...]                         # (TH+2, W+2, c_mid)
    w2 = w2_ref[...]                             # (3, 3, c_mid, c_out)
    acc = jnp.zeros((th * w, c_out), jnp.float32)
    for dx in range(3):
        band = bott[:, dx:dx + w, :]             # (TH+2, W, c_mid)
        for dy in range(3):
            m = band[dy:dy + th].reshape(th * w, c_mid)
            acc = acc + jnp.dot(m, w2[dy, dx], preferred_element_type=jnp.float32)

    # NOTE: c_out = growth (< 128) -> masked store. TODO(synk): lane-dense repack
    # (fold W into the last dim) skipped; needs an in-kernel relayout.
    o_ref[...] = acc.reshape(1, th, w, c_out).astype(o_ref.dtype)


# -----------------------------------------------------------------------------
# Wrappers
# -----------------------------------------------------------------------------
def _pad_layer_params(p, c_total):
    """Zero-pad BN1/conv1 params to the full feature-buffer channel count so the
    kernel can read the whole buffer: channels past the live prefix contribute 0."""
    c_in, c_mid = p["w1"].shape
    pad = c_total - c_in
    return dict(
        s1=jnp.pad(p["s1"], (0, pad)).reshape(1, c_total),
        b1=jnp.pad(p["b1"], (0, pad)).reshape(1, c_total),
        w1=jnp.pad(p["w1"], ((0, pad), (0, 0))),
        s2=p["s2"].reshape(1, c_mid),
        b2=p["b2"].reshape(1, c_mid),
        w2=p["w2"],
    )


def _dense_layer_pallas(feat, pp, th):
    n, h, w, c_total = feat.shape
    c_mid = pp["w1"].shape[1]
    c_out = pp["w2"].shape[-1]
    return pl.pallas_call(
        _dense_layer_kernel,
        out_shape=jax.ShapeDtypeStruct((n, h, w, c_out), jnp.float32),
        grid=(n, h // th),
        in_specs=[
            pl.BlockSpec((1, h, w, c_total), lambda b, j: (b, 0, 0, 0)),
            pl.BlockSpec((1, c_total), lambda b, j: (0, 0)),
            pl.BlockSpec((1, c_total), lambda b, j: (0, 0)),
            pl.BlockSpec((c_total, c_mid), lambda b, j: (0, 0)),
            pl.BlockSpec((1, c_mid), lambda b, j: (0, 0)),
            pl.BlockSpec((1, c_mid), lambda b, j: (0, 0)),
            pl.BlockSpec((3, 3, c_mid, c_out), lambda b, j: (0, 0, 0, 0)),
        ],
        out_specs=pl.BlockSpec((1, th, w, c_out), lambda b, j: (b, j, 0, 0)),
        scratch_shapes=[pltpu.VMEM((th + 2, w + 2, c_mid), jnp.float32)],
        compiler_params=pltpu.CompilerParams(
            dimension_semantics=("parallel", "parallel"),
            vmem_limit_bytes=32 * 1024 * 1024,
        ),
    )(feat, pp["s1"], pp["b1"], pp["w1"], pp["s2"], pp["b2"], pp["w2"])


def dense_block_forward(x_nchw, layer_params):
    """_DenseBlock.forward: NCHW in, NCHW out (channels grow by num_layers*growth)."""
    x = jnp.transpose(x_nchw, (0, 2, 3, 1)).astype(jnp.float32)   # NCHW -> NHWC
    n, h, w, c0 = x.shape
    growth = layer_params[0]["w2"].shape[-1]
    c_total = c0 + len(layer_params) * growth
    th = 8 if h % 8 == 0 else h   # H tile; 1-row halo handled in-kernel

    # Preallocated feature buffer replaces the per-layer torch.cat: each layer's
    # new features are written into their channel slice; unwritten channels are
    # zero and the zero-padded (s1, b1, W1) make them contribute nothing.
    feat = jnp.zeros((n, h, w, c_total), jnp.float32)
    feat = lax.dynamic_update_slice(feat, x, (0, 0, 0, 0))
    c_in = c0
    for p in layer_params:
        pp = _pad_layer_params(p, c_total)
        new = _dense_layer_pallas(feat, pp, th)   # drop_rate = 0: dropout = identity
        feat = lax.dynamic_update_slice(feat, new, (0, 0, 0, c_in))
        c_in += growth
    return jnp.transpose(feat, (0, 3, 1, 2))      # NHWC -> NCHW


# -----------------------------------------------------------------------------
# Deterministic parameter init (BN stats folded into scale/bias)
# -----------------------------------------------------------------------------
def init_layer_params(key, c_in, c_mid, c_out, eps=1e-5):
    ks = jax.random.split(key, 10)
    g1 = jax.random.uniform(ks[0], (c_in,), jnp.float32, 0.5, 1.5)
    be1 = 0.1 * jax.random.normal(ks[1], (c_in,), jnp.float32)
    m1 = 0.1 * jax.random.normal(ks[2], (c_in,), jnp.float32)
    v1 = jax.random.uniform(ks[3], (c_in,), jnp.float32, 0.5, 1.5)
    # conv1: torch weight (c_mid, c_in, 1, 1) -> stored here as (c_in, c_mid)
    w1 = jax.random.normal(ks[4], (c_in, c_mid), jnp.float32) / math.sqrt(c_in)
    g2 = jax.random.uniform(ks[5], (c_mid,), jnp.float32, 0.5, 1.5)
    be2 = 0.1 * jax.random.normal(ks[6], (c_mid,), jnp.float32)
    m2 = 0.1 * jax.random.normal(ks[7], (c_mid,), jnp.float32)
    v2 = jax.random.uniform(ks[8], (c_mid,), jnp.float32, 0.5, 1.5)
    # conv2: torch weight (c_out, c_mid, 3, 3) -> stored here as HWIO (3,3,c_mid,c_out)
    w2 = jax.random.normal(ks[9], (3, 3, c_mid, c_out), jnp.float32) / math.sqrt(
        9 * c_mid
    )
    s1 = g1 / jnp.sqrt(v1 + eps)
    b1 = be1 - m1 * s1
    s2 = g2 / jnp.sqrt(v2 + eps)
    b2 = be2 - m2 * s2
    return dict(s1=s1, b1=b1, w1=w1, s2=s2, b2=b2, w2=w2)


# -----------------------------------------------------------------------------
# Pure-JAX reference (for correctness check)
# -----------------------------------------------------------------------------
def ref_dense_block(x_nchw, layer_params):
    x = jnp.transpose(x_nchw, (0, 2, 3, 1))
    feats = [x]
    for p in layer_params:
        xc = jnp.concatenate(feats, axis=-1)
        a1 = jnp.maximum(xc * p["s1"] + p["b1"], 0.0)
        bott = jnp.einsum("nhwc,cd->nhwd", a1, p["w1"],
                          precision=lax.Precision.HIGHEST)
        a2 = jnp.maximum(bott * p["s2"] + p["b2"], 0.0)
        new = lax.conv_general_dilated(
            a2, p["w2"], window_strides=(1, 1), padding="SAME",
            dimension_numbers=("NHWC", "HWIO", "NHWC"),
            precision=lax.Precision.HIGHEST,
        )
        feats.append(new)
    out = jnp.concatenate(feats, axis=-1)
    return jnp.transpose(out, (0, 3, 1, 2))


# -----------------------------------------------------------------------------
if __name__ == "__main__":
    # _DenseBlock(num_layers=3, num_input_features=4, bn_size=4,
    #             growth_rate=8, drop_rate=0.0)
    N, C0, H, W = 2, 4, 16, 16
    num_layers, bn_size, growth = 3, 4, 8

    key = jax.random.PRNGKey(0)
    kx, kp = jax.random.split(key)
    x = jax.random.normal(kx, (N, C0, H, W), jnp.float32)

    layer_keys = jax.random.split(kp, num_layers)
    params = [
        init_layer_params(layer_keys[i], C0 + i * growth, bn_size * growth, growth)
        for i in range(num_layers)
    ]

    fwd = jax.jit(dense_block_forward)
    out = jax.block_until_ready(fwd(x, params))

    expected_shape = (N, C0 + num_layers * growth, H, W)
    assert out.shape == expected_shape, (out.shape, expected_shape)

    ref = jax.block_until_ready(ref_dense_block(x, params))
    if not jnp.allclose(out, ref, atol=2e-3, rtol=2e-3):
        raise SystemExit("mismatch vs reference: max abs err = %g"
                         % float(jnp.max(jnp.abs(out - ref))))

    print("KERNEL_OK")
</pallas_src>

<mosaic_0001>
module attributes {stable_mosaic.version = 11 : i64} {
  func.func @_dense_layer_kernel(%arg0: i32, %arg1: i32, %arg2: memref<1x16x16x28xf32, #tpu.memory_space<vmem>>, %arg3: memref<1x28xf32, #tpu.memory_space<vmem>>, %arg4: memref<1x28xf32, #tpu.memory_space<vmem>>, %arg5: memref<28x32xf32, #tpu.memory_space<vmem>>, %arg6: memref<1x32xf32, #tpu.memory_space<vmem>>, %arg7: memref<1x32xf32, #tpu.memory_space<vmem>>, %arg8: memref<3x3x32x8xf32, #tpu.memory_space<vmem>>, %arg9: memref<1x8x16x8xf32, #tpu.memory_space<vmem>>, %arg10: memref<10x18x32xf32, #tpu.memory_space<vmem>>) attributes {dimension_semantics = [#tpu.dimension_semantics<parallel>, #tpu.dimension_semantics<parallel>], iteration_bounds = array<i64: 2, 2>, scalar_prefetch = 0 : i64, scratch_operands = 1 : i64, tpu.core_type = #tpu.core_type<tc>, window_params = [{transform_indices = @transform_0, window_bounds = array<i64: 1, 16, 16, 28>}, {pipeline_mode = #tpu.pipeline_mode<synchronous>, transform_indices = @transform_1, window_bounds = array<i64: 1, 28>}, {pipeline_mode = #tpu.pipeline_mode<synchronous>, transform_indices = @transform_2, window_bounds = array<i64: 1, 28>}, {pipeline_mode = #tpu.pipeline_mode<synchronous>, transform_indices = @transform_3, window_bounds = array<i64: 28, 32>}, {pipeline_mode = #tpu.pipeline_mode<synchronous>, transform_indices = @transform_4, window_bounds = array<i64: 1, 32>}, {pipeline_mode = #tpu.pipeline_mode<synchronous>, transform_indices = @transform_5, window_bounds = array<i64: 1, 32>}, {pipeline_mode = #tpu.pipeline_mode<synchronous>, transform_indices = @transform_6, window_bounds = array<i64: 3, 3, 32, 8>}, {transform_indices = @transform_7, window_bounds = array<i64: 1, 8, 16, 8>}]} {
    %c0 = arith.constant 0 : index
    %c0_0 = arith.constant 0 : index
    %0 = vector.load %arg3[%c0, %c0_0] : memref<1x28xf32, #tpu.memory_space<vmem>>, vector<1x28xf32>
    %c0_1 = arith.constant 0 : index
    %c0_2 = arith.constant 0 : index
    %1 = vector.load %arg4[%c0_1, %c0_2] : memref<1x28xf32, #tpu.memory_space<vmem>>, vector<1x28xf32>
    %c0_3 = arith.constant 0 : index
    %c0_4 = arith.constant 0 : index
    %2 = vector.load %arg5[%c0_3, %c0_4] : memref<28x32xf32, #tpu.memory_space<vmem>>, vector<28x32xf32>
    %c0_5 = arith.constant 0 : index
    %c0_6 = arith.constant 0 : index
    %3 = vector.load %arg6[%c0_5, %c0_6] : memref<1x32xf32, #tpu.memory_space<vmem>>, vector<1x32xf32>
    %c0_7 = arith.constant 0 : index
    %c0_8 = arith.constant 0 : index
    %4 = vector.load %arg7[%c0_7, %c0_8] : memref<1x32xf32, #tpu.memory_space<vmem>>, vector<1x32xf32>
    %cst = arith.constant 0.000000e+00 : f32
    %5 = vector.broadcast %cst : f32 to vector<10x18x32xf32>
    %c0_9 = arith.constant 0 : index
    %c0_10 = arith.constant 0 : index
    %c0_11 = arith.constant 0 : index
    %6 = vector.load %arg10[%c0_9, %c0_10, %c0_11] : memref<10x18x32xf32, #tpu.memory_space<vmem>>, vector<10x18x32xf32>
    tpu.vector_store %arg10[%c0_9, %c0_10, %c0_11], %5 {strides = array<i32>} : memref<10x18x32xf32, #tpu.memory_space<vmem>>, vector<10x18x32xf32>,
    %c8_i32 = arith.constant 8 : i32
    %7 = arith.muli %arg1, %c8_i32 : i32
    %8 = tpu.assume_multiple %7, 8 : i32
    %c0_12 = arith.constant 0 : index
    %9 = arith.index_cast %8 : i32 to index
    %c0_13 = arith.constant 0 : index
    %c0_14 = arith.constant 0 : index
    %10 = vector.load %arg2[%c0_12, %9, %c0_13, %c0_14] : memref<1x16x16x28xf32, #tpu.memory_space<vmem>>, vector<1x8x16x28xf32>
    %11 = vector.shape_cast %10 : vector<1x8x16x28xf32> to vector<8x16x28xf32>
    %12 = vector.shape_cast %11 : vector<8x16x28xf32> to vector<128x28xf32>
    %13 = vector.broadcast %0 : vector<1x28xf32> to vector<128x28xf32>
    %14 = arith.mulf %12, %13 : vector<128x28xf32>
    %15 = vector.broadcast %1 : vector<1x28xf32> to vector<128x28xf32>
    %16 = arith.addf %14, %15 : vector<128x28xf32>
    %cst_15 = arith.constant 0.000000e+00 : f32
    %17 = vector.broadcast %cst_15 : f32 to vector<128x28xf32>
    %18 = arith.maximumf %16, %17 : vector<128x28xf32>
    %cst_16 = arith.constant dense<0.000000e+00> : vector<128x32xf32>
    %19 = tpu.matmul %18, %2, %cst_16 {dimension_numbers = #tpu.dot_dimension_numbers<[1], [0], [0], [1], [0, 0, 1, 1], [], []>} : vector<128x28xf32>, vector<28x32xf32>, vector<128x32xf32> -> vector<128x32xf32>
    %20 = vector.broadcast %3 : vector<1x32xf32> to vector<128x32xf32>
    %21 = arith.mulf %19, %20 : vector<128x32xf32>
    %22 = vector.broadcast %4 : vector<1x32xf32> to vector<128x32xf32>
    %23 = arith.addf %21, %22 : vector<128x32xf32>
    %cst_17 = arith.constant 0.000000e+00 : f32
    %24 = vector.broadcast %cst_17 : f32 to vector<128x32xf32>
    %25 = arith.maximumf %23, %24 : vector<128x32xf32>
    %26 = vector.shape_cast %25 : vector<128x32xf32> to vector<8x16x32xf32>
    %c1 = arith.constant 1 : index
    %c1_18 = arith.constant 1 : index
    %c0_19 = arith.constant 0 : index
    %27 = vector.load %arg10[%c1, %c1_18, %c0_19] : memref<10x18x32xf32, #tpu.memory_space<vmem>>, vector<8x16x32xf32>
    tpu.vector_store %arg10[%c1, %c1_18, %c0_19], %26 {strides = array<i32>} : memref<10x18x32xf32, #tpu.memory_space<vmem>>, vector<8x16x32xf32>,
    %c0_i32 = arith.constant 0 : i32
    %28 = arith.cmpi sgt, %arg1, %c0_i32 : i32
    %29 = arith.extui %28 : i1 to i32
    %c0_i32_20 = arith.constant 0 : i32
    %30 = arith.cmpi ne, %29, %c0_i32_20 : i32
    scf.if %30 {
      %c1_i32_43 = arith.constant 1 : i32
      %96 = arith.subi %8, %c1_i32_43 : i32
      %c0_44 = arith.constant 0 : index
      %97 = arith.index_cast %96 : i32 to index
      %c0_45 = arith.constant 0 : index
      %c0_46 = arith.constant 0 : index
      %98 = vector.load %arg2[%c0_44, %97, %c0_45, %c0_46] : memref<1x16x16x28xf32, #tpu.memory_space<vmem>>, vector<1x1x16x28xf32>
      %99 = vector.shape_cast %98 : vector<1x1x16x28xf32> to vector<1x16x28xf32>
      %100 = vector.shape_cast %99 : vector<1x16x28xf32> to vector<16x28xf32>
      %101 = vector.broadcast %0 : vector<1x28xf32> to vector<16x28xf32>
      %102 = arith.mulf %100, %101 : vector<16x28xf32>
      %103 = vector.broadcast %1 : vector<1x28xf32> to vector<16x28xf32>
      %104 = arith.addf %102, %103 : vector<16x28xf32>
      %cst_47 = arith.constant 0.000000e+00 : f32
      %105 = vector.broadcast %cst_47 : f32 to vector<16x28xf32>
      %106 = arith.maximumf %104, %105 : vector<16x28xf32>
      %cst_48 = arith.constant dense<0.000000e+00> : vector<16x32xf32>
      %107 = tpu.matmul %106, %2, %cst_48 {dimension_numbers = #tpu.dot_dimension_numbers<[1], [0], [0], [1], [0, 0, 1, 1], [], []>} : vector<16x28xf32>, vector<28x32xf32>, vector<16x32xf32> -> vector<16x32xf32>
      %108 = vector.broadcast %3 : vector<1x32xf32> to vector<16x32xf32>
      %109 = arith.mulf %107, %108 : vector<16x32xf32>
      %110 = vector.broadcast %4 : vector<1x32xf32> to vector<16x32xf32>
      %111 = arith.addf %109, %110 : vector<16x32xf32>
      %cst_49 = arith.constant 0.000000e+00 : f32
      %112 = vector.broadcast %cst_49 : f32 to vector<16x32xf32>
      %113 = arith.maximumf %111, %112 : vector<16x32xf32>
      %114 = vector.shape_cast %113 : vector<16x32xf32> to vector<1x16x32xf32>
      %c0_50 = arith.constant 0 : index
      %c1_51 = arith.constant 1 : index
      %c0_52 = arith.constant 0 : index
      %115 = vector.load %arg10[%c0_50, %c1_51, %c0_52] : memref<10x18x32xf32, #tpu.memory_space<vmem>>, vector<1x16x32xf32>
      tpu.vector_store %arg10[%c0_50, %c1_51, %c0_52], %114 {strides = array<i32>} : memref<10x18x32xf32, #tpu.memory_space<vmem>>, vector<1x16x32xf32>,
    } else {
    }
    %c1_i32 = arith.constant 1 : i32
    %31 = arith.cmpi slt, %arg1, %c1_i32 : i32
    %32 = arith.extui %31 : i1 to i32
    %c0_i32_21 = arith.constant 0 : i32
    %33 = arith.cmpi ne, %32, %c0_i32_21 : i32
    scf.if %33 {
      %c8_i32_43 = arith.constant 8 : i32
      %96 = arith.addi %8, %c8_i32_43 : i32
      %c0_44 = arith.constant 0 : index
      %97 = arith.index_cast %96 : i32 to index
      %c0_45 = arith.constant 0 : index
      %c0_46 = arith.constant 0 : index
      %98 = vector.load %arg2[%c0_44, %97, %c0_45, %c0_46] : memref<1x16x16x28xf32, #tpu.memory_space<vmem>>, vector<1x1x16x28xf32>
      %99 = vector.shape_cast %98 : vector<1x1x16x28xf32> to vector<1x16x28xf32>
      %100 = vector.shape_cast %99 : vector<1x16x28xf32> to vector<16x28xf32>
      %101 = vector.broadcast %0 : vector<1x28xf32> to vector<16x28xf32>
      %102 = arith.mulf %100, %101 : vector<16x28xf32>
      %103 = vector.broadcast %1 : vector<1x28xf32> to vector<16x28xf32>
      %104 = arith.addf %102, %103 : vector<16x28xf32>
      %cst_47 = arith.constant 0.000000e+00 : f32
      %105 = vector.broadcast %cst_47 : f32 to vector<16x28xf32>
      %106 = arith.maximumf %104, %105 : vector<16x28xf32>
      %cst_48 = arith.constant dense<0.000000e+00> : vector<16x32xf32>
      %107 = tpu.matmul %106, %2, %cst_48 {dimension_numbers = #tpu.dot_dimension_numbers<[1], [0], [0], [1], [0, 0, 1, 1], [], []>} : vector<16x28xf32>, vector<28x32xf32>, vector<16x32xf32> -> vector<16x32xf32>
      %108 = vector.broadcast %3 : vector<1x32xf32> to vector<16x32xf32>
      %109 = arith.mulf %107, %108 : vector<16x32xf32>
      %110 = vector.broadcast %4 : vector<1x32xf32> to vector<16x32xf32>
      %111 = arith.addf %109, %110 : vector<16x32xf32>
      %cst_49 = arith.constant 0.000000e+00 : f32
      %112 = vector.broadcast %cst_49 : f32 to vector<16x32xf32>
      %113 = arith.maximumf %111, %112 : vector<16x32xf32>
      %114 = vector.shape_cast %113 : vector<16x32xf32> to vector<1x16x32xf32>
      %c9 = arith.constant 9 : index
      %c1_50 = arith.constant 1 : index
      %c0_51 = arith.constant 0 : index
      %115 = vector.load %arg10[%c9, %c1_50, %c0_51] : memref<10x18x32xf32, #tpu.memory_space<vmem>>, vector<1x16x32xf32>
      tpu.vector_store %arg10[%c9, %c1_50, %c0_51], %114 {strides = array<i32>} : memref<10x18x32xf32, #tpu.memory_space<vmem>>, vector<1x16x32xf32>,
    } else {
    }
    %c0_22 = arith.constant 0 : index
    %c0_23 = arith.constant 0 : index
    %c0_24 = arith.constant 0 : index
    %34 = vector.load %arg10[%c0_22, %c0_23, %c0_24] : memref<10x18x32xf32, #tpu.memory_space<vmem>>, vector<10x18x32xf32>
    %c0_25 = arith.constant 0 : index
    %c0_26 = arith.constant 0 : index
    %c0_27 = arith.constant 0 : index
    %c0_28 = arith.constant 0 : index
    %35 = vector.load %arg8[%c0_25, %c0_26, %c0_27, %c0_28] : memref<3x3x32x8xf32, #tpu.memory_space<vmem>>, vector<3x3x32x8xf32>
    %cst_29 = arith.constant 0.000000e+00 : f32
    %36 = vector.broadcast %cst_29 : f32 to vector<128x8xf32>
    %37 = vector.extract_strided_slice %34 {offsets = [0, 0, 0], sizes = [10, 16, 32], strides = [1, 1, 1]} : vector<10x18x32xf32> to vector<10x16x32xf32>
    %38 = vector.extract_strided_slice %37 {offsets = [0, 0, 0], sizes = [8, 16, 32], strides = [1, 1, 1]} : vector<10x16x32xf32> to vector<8x16x32xf32>
    %39 = vector.shape_cast %38 : vector<8x16x32xf32> to vector<128x32xf32>
    %40 = vector.extract_strided_slice %35 {offsets = [0, 0, 0, 0], sizes = [1, 1, 32, 8], strides = [1, 1, 1, 1]} : vector<3x3x32x8xf32> to vector<1x1x32x8xf32>
    %41 = vector.shape_cast %40 : vector<1x1x32x8xf32> to vector<32x8xf32>
    %cst_30 = arith.constant dense<0.000000e+00> : vector<128x8xf32>
    %42 = tpu.matmul %39, %41, %cst_30 {dimension_numbers = #tpu.dot_dimension_numbers<[1], [0], [0], [1], [0, 0, 1, 1], [], []>} : vector<128x32xf32>, vector<32x8xf32>, vector<128x8xf32> -> vector<128x8xf32>
    %43 = arith.addf %36, %42 : vector<128x8xf32>
    %44 = vector.extract_strided_slice %37 {offsets = [1, 0, 0], sizes = [8, 16, 32], strides = [1, 1, 1]} : vector<10x16x32xf32> to vector<8x16x32xf32>
    %45 = vector.shape_cast %44 : vector<8x16x32xf32> to vector<128x32xf32>
    %46 = vector.extract_strided_slice %35 {offsets = [1, 0, 0, 0], sizes = [1, 1, 32, 8], strides = [1, 1, 1, 1]} : vector<3x3x32x8xf32> to vector<1x1x32x8xf32>
    %47 = vector.shape_cast %46 : vector<1x1x32x8xf32> to vector<32x8xf32>
    %cst_31 = arith.constant dense<0.000000e+00> : vector<128x8xf32>
    %48 = tpu.matmul %45, %47, %cst_31 {dimension_numbers = #tpu.dot_dimension_numbers<[1], [0], [0], [1], [0, 0, 1, 1], [], []>} : vector<128x32xf32>, vector<32x8xf32>, vector<128x8xf32> -> vector<128x8xf32>
    %49 = arith.addf %43, %48 : vector<128x8xf32>
    %50 = vector.extract_strided_slice %37 {offsets = [2, 0, 0], sizes = [8, 16, 32], strides = [1, 1, 1]} : vector<10x16x32xf32> to vector<8x16x32xf32>
    %51 = vector.shape_cast %50 : vector<8x16x32xf32> to vector<128x32xf32>
    %52 = vector.extract_strided_slice %35 {offsets = [2, 0, 0, 0], sizes = [1, 1, 32, 8], strides = [1, 1, 1, 1]} : vector<3x3x32x8xf32> to vector<1x1x32x8xf32>
    %53 = vector.shape_cast %52 : vector<1x1x32x8xf32> to vector<32x8xf32>
    %cst_32 = arith.constant dense<0.000000e+00> : vector<128x8xf32>
    %54 = tpu.matmul %51, %53, %cst_32 {dimension_numbers = #tpu.dot_dimension_numbers<[1], [0], [0], [1], [0, 0, 1, 1], [], []>} : vector<128x32xf32>, vector<32x8xf32>, vector<128x8xf32> -> vector<128x8xf32>
    %55 = arith.addf %49, %54 : vector<128x8xf32>
    %56 = vector.extract_strided_slice %34 {offsets = [0, 1, 0], sizes = [10, 16, 32], strides = [1, 1, 1]} : vector<10x18x32xf32> to vector<10x16x32xf32>
    %57 = vector.extract_strided_slice %56 {offsets = [0, 0, 0], sizes = [8, 16, 32], strides = [1, 1, 1]} : vector<10x16x32xf32> to vector<8x16x32xf32>
    %58 = vector.shape_cast %57 : vector<8x16x32xf32> to vector<128x32xf32>
    %59 = vector.extract_strided_slice %35 {offsets = [0, 1, 0, 0], sizes = [1, 1, 32, 8], strides = [1, 1, 1, 1]} : vector<3x3x32x8xf32> to vector<1x1x32x8xf32>
    %60 = vector.shape_cast %59 : vector<1x1x32x8xf32> to vector<32x8xf32>
    %cst_33 = arith.constant dense<0.000000e+00> : vector<128x8xf32>
    %61 = tpu.matmul %58, %60, %cst_33 {dimension_numbers = #tpu.dot_dimension_numbers<[1], [0], [0], [1], [0, 0, 1, 1], [], []>} : vector<128x32xf32>, vector<32x8xf32>, vector<128x8xf32> -> vector<128x8xf32>
    %62 = arith.addf %55, %61 : vector<128x8xf32>
    %63 = vector.extract_strided_slice %56 {offsets = [1, 0, 0], sizes = [8, 16, 32], strides = [1, 1, 1]} : vector<10x16x32xf32> to vector<8x16x32xf32>
    %64 = vector.shape_cast %63 : vector<8x16x32xf32> to vector<128x32xf32>
    %65 = vector.extract_strided_slice %35 {offsets = [1, 1, 0, 0], sizes = [1, 1, 32, 8], strides = [1, 1, 1, 1]} : vector<3x3x32x8xf32> to vector<1x1x32x8xf32>
    %66 = vector.shape_cast %65 : vector<1x1x32x8xf32> to vector<32x8xf32>
    %cst_34 = arith.constant dense<0.000000e+00> : vector<128x8xf32>
    %67 = tpu.matmul %64, %66, %cst_34 {dimension_numbers = #tpu.dot_dimension_numbers<[1], [0], [0], [1], [0, 0, 1, 1], [], []>} : vector<128x32xf32>, vector<32x8xf32>, vector<128x8xf32> -> vector<128x8xf32>
    %68 = arith.addf %62, %67 : vector<128x8xf32>
    %69 = vector.extract_strided_slice %56 {offsets = [2, 0, 0], sizes = [8, 16, 32], strides = [1, 1, 1]} : vector<10x16x32xf32> to vector<8x16x32xf32>
    %70 = vector.shape_cast %69 : vector<8x16x32xf32> to vector<128x32xf32>
    %71 = vector.extract_strided_slice %35 {offsets = [2, 1, 0, 0], sizes = [1, 1, 32, 8], strides = [1, 1, 1, 1]} : vector<3x3x32x8xf32> to vector<1x1x32x8xf32>
    %72 = vector.shape_cast %71 : vector<1x1x32x8xf32> to vector<32x8xf32>
    %cst_35 = arith.constant dense<0.000000e+00> : vector<128x8xf32>
    %73 = tpu.matmul %70, %72, %cst_35 {dimension_numbers = #tpu.dot_dimension_numbers<[1], [0], [0], [1], [0, 0, 1, 1], [], []>} : vector<128x32xf32>, vector<32x8xf32>, vector<128x8xf32> -> vector<128x8xf32>
    %74 = arith.addf %68, %73 : vector<128x8xf32>
    %75 = vector.extract_strided_slice %34 {offsets = [0, 2, 0], sizes = [10, 16, 32], strides = [1, 1, 1]} : vector<10x18x32xf32> to vector<10x16x32xf32>
    %76 = vector.extract_strided_slice %75 {offsets = [0, 0, 0], sizes = [8, 16, 32], strides = [1, 1, 1]} : vector<10x16x32xf32> to vector<8x16x32xf32>
    %77 = vector.shape_cast %76 : vector<8x16x32xf32> to vector<128x32xf32>
    %78 = vector.extract_strided_slice %35 {offsets = [0, 2, 0, 0], sizes = [1, 1, 32, 8], strides = [1, 1, 1, 1]} : vector<3x3x32x8xf32> to vector<1x1x32x8xf32>
    %79 = vector.shape_cast %78 : vector<1x1x32x8xf32> to vector<32x8xf32>
    %cst_36 = arith.constant dense<0.000000e+00> : vector<128x8xf32>
    %80 = tpu.matmul %77, %79, %cst_36 {dimension_numbers = #tpu.dot_dimension_numbers<[1], [0], [0], [1], [0, 0, 1, 1], [], []>} : vector<128x32xf32>, vector<32x8xf32>, vector<128x8xf32> -> vector<128x8xf32>
    %81 = arith.addf %74, %80 : vector<128x8xf32>
    %82 = vector.extract_strided_slice %75 {offsets = [1, 0, 0], sizes = [8, 16, 32], strides = [1, 1, 1]} : vector<10x16x32xf32> to vector<8x16x32xf32>
    %83 = vector.shape_cast %82 : vector<8x16x32xf32> to vector<128x32xf32>
    %84 = vector.extract_strided_slice %35 {offsets = [1, 2, 0, 0], sizes = [1, 1, 32, 8], strides = [1, 1, 1, 1]} : vector<3x3x32x8xf32> to vector<1x1x32x8xf32>
    %85 = vector.shape_cast %84 : vector<1x1x32x8xf32> to vector<32x8xf32>
    %cst_37 = arith.constant dense<0.000000e+00> : vector<128x8xf32>
    %86 = tpu.matmul %83, %85, %cst_37 {dimension_numbers = #tpu.dot_dimension_numbers<[1], [0], [0], [1], [0, 0, 1, 1], [], []>} : vector<128x32xf32>, vector<32x8xf32>, vector<128x8xf32> -> vector<128x8xf32>
    %87 = arith.addf %81, %86 : vector<128x8xf32>
    %88 = vector.extract_strided_slice %75 {offsets = [2, 0, 0], sizes = [8, 16, 32], strides = [1, 1, 1]} : vector<10x16x32xf32> to vector<8x16x32xf32>
    %89 = vector.shape_cast %88 : vector<8x16x32xf32> to vector<128x32xf32>
    %90 = vector.extract_strided_slice %35 {offsets = [2, 2, 0, 0], sizes = [1, 1, 32, 8], strides = [1, 1, 1, 1]} : vector<3x3x32x8xf32> to vector<1x1x32x8xf32>
    %91 = vector.shape_cast %90 : vector<1x1x32x8xf32> to vector<32x8xf32>
    %cst_38 = arith.constant dense<0.000000e+00> : vector<128x8xf32>
    %92 = tpu.matmul %89, %91, %cst_38 {dimension_numbers = #tpu.dot_dimension_numbers<[1], [0], [0], [1], [0, 0, 1, 1], [], []>} : vector<128x32xf32>, vector<32x8xf32>, vector<128x8xf32> -> vector<128x8xf32>
    %93 = arith.addf %87, %92 : vector<128x8xf32>
    %94 = vector.shape_cast %93 : vector<128x8xf32> to vector<1x8x16x8xf32>
    %c0_39 = arith.constant 0 : index
    %c0_40 = arith.constant 0 : index
    %c0_41 = arith.constant 0 : index
    %c0_42 = arith.constant 0 : index
    %95 = vector.load %arg9[%c0_39, %c0_40, %c0_41, %c0_42] : memref<1x8x16x8xf32, #tpu.memory_space<vmem>>, vector<1x8x16x8xf32>
    tpu.vector_store %arg9[%c0_39, %c0_40, %c0_41, %c0_42], %94 {strides = array<i32>} : memref<1x8x16x8xf32, #tpu.memory_space<vmem>>, vector<1x8x16x8xf32>,
    return
  }
  func.func @transform_0(%arg0: i32, %arg1: i32) -> (i32, i32, i32, i32) {
    %c0_i32 = arith.constant 0 : i32
    %c0_i32_0 = arith.constant 0 : i32
    %c0_i32_1 = arith.constant 0 : i32
    %c0_i32_2 = arith.constant 0 : i32
    return %arg0, %c0_i32, %c0_i32_0, %c0_i32_1 : i32, i32, i32, i32
  }
  func.func @transform_1(%arg0: i32, %arg1: i32) -> (i32, i32) {
    %c0_i32 = arith.constant 0 : i32
    %c0_i32_0 = arith.constant 0 : i32
    %c0_i32_1 = arith.constant 0 : i32
    return %c0_i32, %c0_i32_0 : i32, i32
  }
  func.func @transform_2(%arg0: i32, %arg1: i32) -> (i32, i32) {
    %c0_i32 = arith.constant 0 : i32
    %c0_i32_0 = arith.constant 0 : i32
    %c0_i32_1 = arith.constant 0 : i32
    return %c0_i32, %c0_i32_0 : i32, i32
  }
  func.func @transform_3(%arg0: i32, %arg1: i32) -> (i32, i32) {
    %c0_i32 = arith.constant 0 : i32
    %c0_i32_0 = arith.constant 0 : i32
    %c0_i32_1 = arith.constant 0 : i32
    return %c0_i32, %c0_i32_0 : i32, i32
  }
  func.func @transform_4(%arg0: i32, %arg1: i32) -> (i32, i32) {
    %c0_i32 = arith.constant 0 : i32
    %c0_i32_0 = arith.constant 0 : i32
    %c0_i32_1 = arith.constant 0 : i32
    return %c0_i32, %c0_i32_0 : i32, i32
  }
  func.func @transform_5(%arg0: i32, %arg1: i32) -> (i32, i32) {
    %c0_i32 = arith.constant 0 : i32
    %c0_i32_0 = arith.constant 0 : i32
    %c0_i32_1 = arith.constant 0 : i32
    return %c0_i32, %c0_i32_0 : i32, i32
  }
  func.func @transform_6(%arg0: i32, %arg1: i32) -> (i32, i32, i32, i32) {
    %c0_i32 = arith.constant 0 : i32
    %c0_i32_0 = arith.constant 0 : i32
    %c0_i32_1 = arith.constant 0 : i32
    %c0_i32_2 = arith.constant 0 : i32
    %c0_i32_3 = arith.constant 0 : i32
    return %c0_i32, %c0_i32_0, %c0_i32_1, %c0_i32_2 : i32, i32, i32, i32
  }
  func.func @transform_7(%arg0: i32, %arg1: i32) -> (i32, i32, i32, i32) {
    %c0_i32 = arith.constant 0 : i32
    %c0_i32_0 = arith.constant 0 : i32
    %c0_i32_1 = arith.constant 0 : i32
    return %arg0, %arg1, %c0_i32, %c0_i32_0 : i32, i32, i32, i32
  }
}

</mosaic_0001>

<bundles_post_ra>
// kernel: dense_block_forward.3
= control target key start
LH: loop header
LB: loop body
LE: loop exit
PB: predicated region body
PF: predicated region fallthrough
CT: control target
= control target key end

     0   :  { %s2190_s24 = smov 0   ;;  %s2192_s25 = smov 0   ;;  %s3188_s0 = inlined_call_operand.vmem [shape: f32[2,16,16,28], index: 0, kind: input, shape index: {}]   ;;  %s3189_s1 = inlined_call_operand.vmem [shape: f32[1,28], index: 1, kind: input, shape index: {}]   ;;  %s3190_s2 = inlined_call_operand.vmem [shape: f32[1,28], index: 2, kind: input, shape index: {}]   ;;  %s3191_s3 = inlined_call_operand.vmem [shape: f32[28,32], index: 3, kind: input, shape index: {}]   ;;  %s3192_s4 = inlined_call_operand.vmem [shape: f32[1,32], index: 4, kind: input, shape index: {}]   ;;  %s3193_s5 = inlined_call_operand.vmem [shape: f32[1,32], index: 5, kind: input, shape index: {}]   ;;  %s3194_s6 = inlined_call_operand.vmem [shape: f32[3,3,32,8], index: 6, kind: input, shape index: {}]   ;;  %s3195_s7 = inlined_call_operand.vmem [shape: f32[2,16,16,8], index: 7, kind: output, shape index: {}]  }
   0x1   :  { %s2194_s26 = smov 0   ;;  %s2196_s27 = smov 0  }
   0x2   :  { %s2198_s28 = smov 0  }
   0x3 LB: > { %s26_s29 = sadd.s32 1, %s2139_s26  ;;  %s29_s30 = sadd.s32 1, %s2143_s27  ;;  %s2147_s28 = sphi %s2198_s28, %s17_s28   ;;  %s2143_s27 = sphi %s2196_s27, %s3215_s27   ;;  %s2139_s26 = sphi %s2194_s26, %s3214_s26   ;;  %s2135_s25 = sphi %s2192_s25, %s3213_s25   ;;  %s2131_s24 = sphi %s2190_s24, %s3212_s24  }
   0x4   : > { %p27_p0 = scmp.ge.s32.totalorder %s26_s29, 2  ;;  %p1845_p1 = scmp.ge.s32.totalorder %s2147_s28, 1 }
   0x5   : > { %p251_p2 = scmp.lt.s32.totalorder %s2147_s28, 5 }
   0x6   : > { %s3217_s29 = smov (%p27_p0, %s26_s29), 0  ;;  %s3219_s30 = smov (!%p27_p0, %s29_s30), %s2143_s27 }
   0x7   : > { %p252_p3 = pnand %p1845_p1, %p251_p2  ;;  %p31_p4 = scmp.ge.s32.totalorder %s3219_s30, 2 }
   0x9   : > { %s3221_s30 = smov (%p31_p4, %s3219_s30), 0  ;;  %255 = sbr.rel (%p252_p3) target bundleno = 909 (0x38d), region = 48 }
   0xe   : > { %v2225_v0 = vld [vmem:[%s3191_s3 + $0x18] sm:$0xf]  ;;  %vm466_vm0 = vcmask 1043456   ;;  %v2230_v1 = vld [vmem:[%s3191_s3 + $0x10] sm:$0xff]  ;;  %p288_p5 = scmp.lt.s32.totalorder %s2135_s25, 1  ;;  %s2237_s12 = sshll.u32 %s2131_s24, 3 }
   0xf   : > { %2035 = vmatpush.msk.msra.mxu2 %vm466_vm0, %v2225_v0  ;;  %2036 = vmatpush.msk.msra.mxu3 %vm466_vm0, %v2225_v0  ;;  %v2242_v2 = vld [vmem:[%s3191_s3 + $0x8] sm:$0xff]  ;;  %p296_p6 = scmp.lt.s32.totalorder %s2237_s12, 15  ;;  %v2256_v3 = vld [vmem:[%s3191_s3] sm:$0xff]  ;;  %s2032_s18 = sshll.u32 %s2131_s24, 7  ;;  %vm312_vm1 = vcmask 261120   ;;  %v2149_v15 = vmov 0.0  }
  0x10   : > { %1854 = vmatpush.msk.msra.mxu0 %vm466_vm0, %v2225_v0  ;;  %2034 = vmatpush.msk.msra.mxu1 %vm466_vm0, %v2225_v0  ;;  %s3223_s25 = smov (!%p288_p5, %s2135_s25), 1  ;;  %v2273_v4 = vld [vmem:[%s3189_s1] ss:$0 sm:$0xff]  ;;  %313 = vst.msk [vmem:[#allocation2] sm:$0xff] %vm312_vm1, %v2149_v15  ;;  %vm417_vm2 = vcmask 228352   ;;  %vm315_vm3 = vcmask 254976  }
  0x11   : > { %2038 = vmatpush.msra.mxu2 %v2230_v1  ;;  %2039 = vmatpush.msra.mxu3 %v2230_v1  ;;  %s2031_s17 = sshll.u32 %s3223_s25, 8  ;;  %s1850_s22 = sshll.u32 %s3223_s25, 5  ;;  %v2286_v5 = vld [vmem:[%s3190_s2] ss:$0 sm:$0xff]  ;;  %314 = vst.msk [vmem:[#allocation2 + $0x8] sm:$0xff] %vm312_vm1, %v2149_v15 }
  0x12   : > { %483 = vmatpush.msra.mxu0 %v2230_v1  ;;  %2037 = vmatpush.msra.mxu1 %v2230_v1  ;;  %s2267_s21 = scalar_lea.vmem %s3188_s0, %s2031_s17  ;;  %317 = vst.msk [vmem:[#allocation2 + $0x18] sm:$0xff] %vm312_vm1, %v2149_v15  ;;  %p1871_p7 = scmp.le.s32.totalorder %s2131_s24, 0 }
  0x13   : > { %2041 = vmatpush.msra.mxu2 %v2242_v2  ;;  %2042 = vmatpush.msra.mxu3 %v2242_v2  ;;  %s297_s9 = scalar_select %p296_p6, %s2237_s12, 15  ;;  %318 = vst.msk [vmem:[#allocation2 + $0x20] sm:$0xff] %vm312_vm1, %v2149_v15 }
  0x14   : > { %484 = vmatpush.msra.mxu0 %v2242_v2  ;;  %2040 = vmatpush.msra.mxu1 %v2242_v2  ;;  %s2281_s10 = scalar_lea.vmem %s2267_s21, %s2032_s18  ;;  %341 = vst.msk [vmem:[#allocation2 + $0xd8] sm:$0xff] %vm312_vm1, %v2149_v15  ;;  %s1872_s8 = sadd.s32 (!%p1871_p7), 4294967295, %s2237_s12 }
  0x15   : > { %2044 = vmatpush.msra.mxu2 %v2256_v3  ;;  %2045 = vmatpush.msra.mxu3 %v2256_v3  ;;  %s1849_s25 = sshll.u32 %s297_s9, 1  ;;  %v355_v6 = vld [vmem:[%s2281_s10 + $0x40] sm:$0xff]  ;;  %v356_v13 = vld [vmem:[%s2281_s10 + $0x48] sm:$0xff]  ;;  %v357_v35 = vld [vmem:[%s2281_s10 + $0x50] sm:$0xff]  ;;  %342 = vst.msk [vmem:[#allocation2 + $0xe0] sm:$0xff] %vm312_vm1, %v2149_v15  ;;  %s1873_s9 = sshll.u32 (!%p1871_p7), %s1872_s8, 4 }
  0x16   : > { %v359_v7 = vld [vmem:[%s2281_s10 + $0x60] sm:$0xff]  ;;  %485 = vmatpush.msra.mxu0 %v2256_v3  ;;  %2043 = vmatpush.msra.mxu1 %v2256_v3  ;;  %s300_s14 = sadd.s32 %s1850_s22, %s1849_s25  ;;  %v374_v9 = vmul.f32 %v2273_v4, %v355_v6  ;;  %v360_v14 = vld [vmem:[%s2281_s10 + $0x68] sm:$0xff]  ;;  %v375_v17 = vmul.f32 %v2273_v4, %v356_v13  ;;  %v361_v36 = vld [vmem:[%s2281_s10 + $0x70] sm:$0xff]  ;;  %320 = vst.msk [vmem:[#allocation2 + $0x30] sm:$0xff] %vm312_vm1, %v2149_v15  ;;  %s612_s11 = scalar_lea.vmem (!%p1871_p7), %s2267_s21, %s1873_s9 }
  0x17   : > { %v347_v8 = vld [vmem:[%s2281_s10] sm:$0xff]  ;;  %v378_v10 = vmul.f32 %v2273_v4, %v359_v7  ;;  %s1851_s15 = sshll.u32 %s300_s14, 3  ;;  %v348_v18 = vld [vmem:[%s2281_s10 + $0x8] sm:$0xff]  ;;  %v379_v23 = vmul.f32 %v2273_v4, %v360_v14  ;;  %v349_v37 = vld [vmem:[%s2281_s10 + $0x10] sm:$0xff]  ;;  %v376_v41 = vmul.f32 %v2273_v4, %v357_v35  ;;  %v380_v42 = vmul.f32 %v2273_v4, %v361_v36  ;;  %321 = vst.msk [vmem:[#allocation2 + $0x38] sm:$0xff] %vm312_vm1, %v2149_v15 }
  0x18   : > { %v366_v11 = vmul.f32 %v2273_v4, %v347_v8  ;;  %v351_v12 = vld [vmem:[%s2281_s10 + $0x20] sm:$0xff]  ;;  %v352_v19 = vld [vmem:[%s2281_s10 + $0x28] sm:$0xff]  ;;  %s2310_s18 = scalar_lea.vmem %s3195_s7, %s1851_s15  ;;  %v393_v20 = vadd.f32 %v2286_v5, %v374_v9  ;;  %v367_v25 = vmul.f32 %v2273_v4, %v348_v18  ;;  %v394_v31 = vadd.f32 %v2286_v5, %v375_v17  ;;  %v353_v38 = vld [vmem:[%s2281_s10 + $0x30] sm:$0xff]  ;;  %323 = vst.msk [vmem:[#allocation2 + $0x48] sm:$0xff] %vm312_vm1, %v2149_v15 }
  0x19   : > { %v370_v16 = vmul.f32 %v2273_v4, %v351_v12  ;;  %v397_v21 = vadd.f32 %v2286_v5, %v378_v10  ;;  %v371_v26 = vmul.f32 %v2273_v4, %v352_v19  ;;  %v398_v32 = vadd.f32 %v2286_v5, %v379_v23  ;;  %324 = vst.msk [vmem:[#allocation2 + $0x50] sm:$0xff] %vm312_vm1, %v2149_v15  ;;  %v358_v51 = vld [vmem:[%s2281_s10 + $0x58] sm:$0xff]  ;;  %v310_v13 = vld [vmem:[%s3192_s4] sm:$0x1] }
  0x1a   : > { %v385_v22 = vadd.f32 %v2286_v5, %v366_v11  ;;  %v409_v27 = vmax.f32 %v393_v20, 0.0  ;;  %v386_v33 = vadd.f32 %v2286_v5, %v367_v25  ;;  %v410_v39 = vmax.f32 %v394_v31, 0.0  ;;  %326 = vst.msk [vmem:[#allocation2 + $0x60] sm:$0xff] %vm312_vm1, %v2149_v15  ;;  %v362_v52 = vld [vmem:[%s2281_s10 + $0x78] sm:$0xff]  ;;  %v311_v14 = vld [vmem:[%s3193_s5] sm:$0x1] }
  0x1b   : > { %v389_v24 = vadd.f32 %v2286_v5, %v370_v16  ;;  %v413_v28 = vmax.f32 %v397_v21, 0.0  ;;  %v390_v34 = vadd.f32 %v2286_v5, %v371_v26  ;;  %v414_v40 = vmax.f32 %v398_v32, 0.0  ;;  %327 = vst.msk [vmem:[#allocation2 + $0x68] sm:$0xff] %vm312_vm1, %v2149_v15  ;;  %v350_v53 = vld [vmem:[%s2281_s10 + $0x18] sm:$0xff] }
  0x1c   : > { %v401_v29 = vmax.f32 %v385_v22, 0.0  ;;  %1863 = vmatmul.msk.f32.vlgmr.msra.gmra.mxu2 %vm417_vm2, %v409_v27  ;;  %v402_v43 = vmax.f32 %v386_v33, 0.0  ;;  %v368_v45 = vmul.f32 %v2273_v4, %v349_v37  ;;  %v372_v46 = vmul.f32 %v2273_v4, %v353_v38  ;;  %329 = vst.msk [vmem:[#allocation2 + $0x78] sm:$0xff] %vm312_vm1, %v2149_v15  ;;  %v354_v54 = vld [vmem:[%s2281_s10 + $0x38] sm:$0xff] }
  0x1d   : > { %v405_v30 = vmax.f32 %v389_v24, 0.0  ;;  %1867 = vmatmul.msk.f32.vlgmr.msra.gmra.mxu3 %vm417_vm2, %v413_v28  ;;  %v406_v44 = vmax.f32 %v390_v34, 0.0  ;;  %v395_v47 = vadd.f32 %v2286_v5, %v376_v41  ;;  %v399_v48 = vadd.f32 %v2286_v5, %v380_v42  ;;  %330 = vst.msk [vmem:[#allocation2 + $0x80] sm:$0xff] %vm312_vm1, %v2149_v15 }
  0x1e   : > { %1855 = vmatmul.msk.f32.vlgmr.msra.gmra.mxu0 %vm417_vm2, %v401_v29  ;;  %v387_v49 = vadd.f32 %v2286_v5, %v368_v45  ;;  %v391_v50 = vadd.f32 %v2286_v5, %v372_v46  ;;  %332 = vst.msk [vmem:[#allocation2 + $0x90] sm:$0xff] %vm312_vm1, %v2149_v15  ;;  %v377_v57 = vmul.f32 %v2273_v4, %v358_v51  ;;  %v2415_v16 = vperm.slane %v310_v13, 0 }
  0x1f   : > { %1859 = vmatmul.msk.f32.vlgmr.msra.gmra.mxu1 %vm417_vm2, %v405_v30  ;;  %v411_v55 = vmax.f32 %v395_v47, 0.0  ;;  %v415_v56 = vmax.f32 %v399_v48, 0.0  ;;  %v381_v58 = vmul.f32 %v2273_v4, %v362_v52  ;;  %333 = vst.msk [vmem:[#allocation2 + $0x98] sm:$0xff] %vm312_vm1, %v2149_v15  ;;  %v369_v61 = vmul.f32 %v2273_v4, %v350_v53 }
  0x20   : > { %v403_v59 = vmax.f32 %v387_v49, 0.0  ;;  %v407_v60 = vmax.f32 %v391_v50, 0.0  ;;  %v373_v62 = vmul.f32 %v2273_v4, %v354_v54  ;;  %335 = vst.msk [vmem:[#allocation2 + $0xa8] sm:$0xff] %vm312_vm1, %v2149_v15  ;;  %v396_v63 = vadd.f32 %v2286_v5, %v377_v57 }
  0x21   : > { %336 = vst.msk [vmem:[#allocation2 + $0xb0] sm:$0xff] %vm312_vm1, %v2149_v15  ;;  %v400_v6 = vadd.f32 %v2286_v5, %v381_v58  ;;  %v388_v7 = vadd.f32 %v2286_v5, %v369_v61  ;;  %v2417_v17 = vperm.slane %v311_v14, 0 }
  0x22   : > { %338 = vst.msk [vmem:[#allocation2 + $0xc0] sm:$0xff] %vm312_vm1, %v2149_v15  ;;  %v392_v8 = vadd.f32 %v2286_v5, %v373_v62  ;;  %v412_v9 = vmax.f32 %v396_v63, 0.0 }
  0x23   : > { %339 = vst.msk [vmem:[#allocation2 + $0xc8] sm:$0xff] %vm312_vm1, %v2149_v15  ;;  %v416_v10 = vmax.f32 %v400_v6, 0.0  ;;  %v404_v11 = vmax.f32 %v388_v7, 0.0 }
  0x24   : > { %1864 = vmatmul.msk.f32.gmra.mxu2 %vm417_vm2, %v410_v39  ;;  %v408_v12 = vmax.f32 %v392_v8, 0.0  ;;  %316 = vst.msk [vmem:[#allocation2 + $0x10] sm:$0x3] %vm315_vm3, %v2149_v15 }
  0x25   : > { %1868 = vmatmul.msk.f32.gmra.mxu3 %vm417_vm2, %v414_v40  ;;  %319 = vst.msk [vmem:[#allocation2 + $0x28] sm:$0x3] %vm315_vm3, %v2149_v15 }
  0x26   : > { %1856 = vmatmul.msk.f32.gmra.mxu0 %vm417_vm2, %v402_v43  ;;  %343 = vst.msk [vmem:[#allocation2 + $0xe8] sm:$0x3] %vm315_vm3, %v2149_v15 }
  0x27   : > { %1860 = vmatmul.msk.f32.gmra.mxu1 %vm417_vm2, %v406_v44  ;;  %322 = vst.msk [vmem:[#allocation2 + $0x40] sm:$0x3] %vm315_vm3, %v2149_v15 }
  0x28   : > { %325 = vst.msk [vmem:[#allocation2 + $0x58] sm:$0x3] %vm315_vm3, %v2149_v15 }
  0x29   : > { %328 = vst.msk [vmem:[#allocation2 + $0x70] sm:$0x3] %vm315_vm3, %v2149_v15 }
  0x2a   : > { %331 = vst.msk [vmem:[#allocation2 + $0x88] sm:$0x3] %vm315_vm3, %v2149_v15 }
  0x2b   : > { %334 = vst.msk [vmem:[#allocation2 + $0xa0] sm:$0x3] %vm315_vm3, %v2149_v15 }
  0x2c   : > { %1865 = vmatmul.msk.f32.gmra.mxu2 %vm417_vm2, %v411_v55  ;;  %337 = vst.msk [vmem:[#allocation2 + $0xb8] sm:$0x3] %vm315_vm3, %v2149_v15 }
  0x2d   : > { %1869 = vmatmul.msk.f32.gmra.mxu3 %vm417_vm2, %v415_v56  ;;  %340 = vst.msk [vmem:[#allocation2 + $0xd0] sm:$0x3] %vm315_vm3, %v2149_v15 }
  0x2e   : > { %1857 = vmatmul.msk.f32.gmra.mxu0 %vm417_vm2, %v403_v59 }
  0x2f   : > { %1861 = vmatmul.msk.f32.gmra.mxu1 %vm417_vm2, %v407_v60 }
  0x34   : > { %1866 = vmatmul.msk.f32.gmra.mxu2 %vm417_vm2, %v412_v9 }
  0x35   : > { %1870 = vmatmul.msk.f32.gmra.mxu3 %vm417_vm2, %v416_v10 }
  0x36   : > { %1858 = vmatmul.msk.f32.gmra.mxu0 %vm417_vm2, %v404_v11 }
  0x37   : > { %1862 = vmatmul.msk.f32.gmra.mxu1 %vm417_vm2, %v408_v12 }
  0x9b   : > { %v487_v18 = vpop.f32.mrf.mxu0 }
  0x9c   : > { %v499_v19 = vpop.f32.mrf.mxu1  ;;  %v538_v20 = vmul.f32 %v2415_v16, %v487_v18 }
  0x9d   : > { %v542_v21 = vmul.f32 %v2415_v16, %v499_v19 }
  0x9e   : > { %v557_v15 = vadd.f32 %v2417_v17, %v538_v20 }
  0x9f   : > { %v561_v22 = vadd.f32 %v2417_v17, %v542_v21  ;;  %v511_v25 = vpop.f32.mrf.mxu2 }
  0xa0   : > { %v573_v23 = vmax.f32 %v557_v15, 0.0  ;;  %v523_v26 = vpop.f32.mrf.mxu3  ;;  %v546_v27 = vmul.f32 %v2415_v16, %v511_v25 }
  0xa1   : > { %v577_v24 = vmax.f32 %v561_v22, 0.0  ;;  %v550_v28 = vmul.f32 %v2415_v16, %v523_v26 }
  0xa2   : > { %590 = vst.msk [vmem:[#allocation2 + $0x19] sm:$0xff] %vm312_vm1, %v573_v23  ;;  %v565_v29 = vadd.f32 %v2417_v17, %v546_v27 }
  0xa3   : > { %594 = vst.msk [vmem:[#allocation2 + $0x49] sm:$0xff] %vm312_vm1, %v577_v24  ;;  %v569_v30 = vadd.f32 %v2417_v17, %v550_v28  ;;  %v490_v31 = vpop.f32.mrf.mxu0 }
  0xa4   : > { %v502_v32 = vpop.f32.mrf.mxu1  ;;  %v539_v33 = vmul.f32 %v2415_v16, %v490_v31  ;;  %v581_v35 = vmax.f32 %v565_v29, 0.0 }
  0xa5   : > { %v543_v34 = vmul.f32 %v2415_v16, %v502_v32  ;;  %v585_v36 = vmax.f32 %v569_v30, 0.0 }
  0xa6   : > { %v558_v37 = vadd.f32 %v2417_v17, %v539_v33  ;;  %598 = vst.msk [vmem:[#allocation2 + $0x79] sm:$0xff] %vm312_vm1, %v581_v35 }
  0xa7   : > { %v562_v38 = vadd.f32 %v2417_v17, %v543_v34  ;;  %602 = vst.msk [vmem:[#allocation2 + $0xa9] sm:$0xff] %vm312_vm1, %v585_v36  ;;  %v514_v41 = vpop.f32.mrf.mxu2 }
  0xa8   : > { %v574_v39 = vmax.f32 %v558_v37, 0.0  ;;  %v526_v42 = vpop.f32.mrf.mxu3  ;;  %v547_v43 = vmul.f32 %v2415_v16, %v514_v41 }
  0xa9   : > { %v578_v40 = vmax.f32 %v562_v38, 0.0  ;;  %v551_v44 = vmul.f32 %v2415_v16, %v526_v42 }
  0xaa   : > { %591 = vst.msk [vmem:[#allocation2 + $0x21] sm:$0xff] %vm312_vm1, %v574_v39  ;;  %v566_v45 = vadd.f32 %v2417_v17, %v547_v43 }
  0xab   : > { %595 = vst.msk [vmem:[#allocation2 + $0x51] sm:$0xff] %vm312_vm1, %v578_v40  ;;  %v570_v46 = vadd.f32 %v2417_v17, %v551_v44  ;;  %v493_v47 = vpop.f32.mrf.mxu0 }
  0xac   : > { %v505_v48 = vpop.f32.mrf.mxu1  ;;  %v540_v49 = vmul.f32 %v2415_v16, %v493_v47  ;;  %v582_v51 = vmax.f32 %v566_v45, 0.0 }
  0xad   : > { %v544_v50 = vmul.f32 %v2415_v16, %v505_v48  ;;  %v586_v52 = vmax.f32 %v570_v46, 0.0 }
  0xae   : > { %v559_v53 = vadd.f32 %v2417_v17, %v540_v49  ;;  %599 = vst.msk [vmem:[#allocation2 + $0x81] sm:$0xff] %vm312_vm1, %v582_v51 }
  0xaf   : > { %v563_v54 = vadd.f32 %v2417_v17, %v544_v50  ;;  %603 = vst.msk [vmem:[#allocation2 + $0xb1] sm:$0xff] %vm312_vm1, %v586_v52  ;;  %v517_v57 = vpop.f32.mrf.mxu2 }
  0xb0   : > { %v575_v55 = vmax.f32 %v559_v53, 0.0  ;;  %v529_v58 = vpop.f32.mrf.mxu3  ;;  %v548_v59 = vmul.f32 %v2415_v16, %v517_v57 }
  0xb1   : > { %v579_v56 = vmax.f32 %v563_v54, 0.0  ;;  %v552_v60 = vmul.f32 %v2415_v16, %v529_v58 }
  0xb2   : > { %592 = vst.msk [vmem:[#allocation2 + $0x31] sm:$0xff] %vm312_vm1, %v575_v55  ;;  %v567_v61 = vadd.f32 %v2417_v17, %v548_v59 }
  0xb3   : > { %596 = vst.msk [vmem:[#allocation2 + $0x61] sm:$0xff] %vm312_vm1, %v579_v56  ;;  %v571_v62 = vadd.f32 %v2417_v17, %v552_v60  ;;  %v496_v63 = vpop.f32.mrf.mxu0 }
  0xb4   : > { %v508_v6 = vpop.f32.mrf.mxu1  ;;  %v541_v7 = vmul.f32 %v2415_v16, %v496_v63  ;;  %v583_v9 = vmax.f32 %v567_v61, 0.0 }
  0xb5   : > { %v545_v8 = vmul.f32 %v2415_v16, %v508_v6  ;;  %v587_v10 = vmax.f32 %v571_v62, 0.0 }
  0xb6   : > { %v560_v11 = vadd.f32 %v2417_v17, %v541_v7  ;;  %600 = vst.msk [vmem:[#allocation2 + $0x91] sm:$0xff] %vm312_vm1, %v583_v9 }
  0xb7   : > { %v564_v12 = vadd.f32 %v2417_v17, %v545_v8  ;;  %604 = vst.msk [vmem:[#allocation2 + $0xc1] sm:$0xff] %vm312_vm1, %v587_v10  ;;  %v520_v18 = vpop.f32.mrf.mxu2 }
  0xb8   : > { %v576_v13 = vmax.f32 %v560_v11, 0.0  ;;  %v532_v19 = vpop.f32.mrf.mxu3  ;;  %v549_v20 = vmul.f32 %v2415_v16, %v520_v18 }
  0xb9   : > { %v580_v14 = vmax.f32 %v564_v12, 0.0  ;;  %v553_v21 = vmul.f32 %v2415_v16, %v532_v19 }
  0xba   : > { %593 = vst.msk [vmem:[#allocation2 + $0x39] sm:$0xff] %vm312_vm1, %v576_v13  ;;  %v568_v15 = vadd.f32 %v2417_v17, %v549_v20 }
  0xbb   : > { %597 = vst.msk [vmem:[#allocation2 + $0x69] sm:$0xff] %vm312_vm1, %v580_v14  ;;  %v572_v22 = vadd.f32 %v2417_v17, %v553_v21  ;;  %609 = sbr.rel (%p1871_p7) target bundleno = 333 (0x14d), region = 52 }
  0xbc   : > { %v584_v23 = vmax.f32 %v568_v15, 0.0 }
  0xbd   : > { %v588_v24 = vmax.f32 %v572_v22, 0.0 }
  0xbe   : > { %601 = vst.msk [vmem:[#allocation2 + $0x99] sm:$0xff] %vm312_vm1, %v584_v23 }
  0xbf   : > { %605 = vst.msk [vmem:[#allocation2 + $0xc9] sm:$0xff] %vm312_vm1, %v588_v24 }
  0xc0   : > { %1874 = vmatpush.msk.msra.mxu0 %vm466_vm0, %v2225_v0  ;;  %2046 = vmatpush.msk.msra.mxu1 %vm466_vm0, %v2225_v0  ;;  %v613_v25 = vld [vmem:[%s612_s11] sm:$0xff]  ;;  %v614_v26 = vld [vmem:[%s612_s11 + $0x8] sm:$0xff] }
  0xc1   : > { %v615_v27 = vmul.f32 %v2273_v4, %v613_v25  ;;  %v616_v28 = vmul.f32 %v2273_v4, %v614_v26 }
  0xc2   : > { %640 = vmatpush.msra.mxu0 %v2230_v1  ;;  %2047 = vmatpush.msra.mxu1 %v2230_v1 }
  0xc3   : > { %v617_v29 = vadd.f32 %v2286_v5, %v615_v27  ;;  %v618_v30 = vadd.f32 %v2286_v5, %v616_v28 }
  0xc4   : > { %641 = vmatpush.msra.mxu0 %v2242_v2  ;;  %2048 = vmatpush.msra.mxu1 %v2242_v2 }
  0xc5   : > { %v619_v31 = vmax.f32 %v617_v29, 0.0  ;;  %v620_v32 = vmax.f32 %v618_v30, 0.0 }
  0xc6   : > { %642 = vmatpush.msra.mxu0 %v2256_v3  ;;  %2049 = vmatpush.msra.mxu1 %v2256_v3 }
  0xc7   : > { %1875 = vmatmul.msk.f32.vlgmr.msra.gmra.mxu0 %vm417_vm2, %v619_v31  ;;  %1876 = vmatmul.msk.f32.vlgmr.msra.gmra.mxu1 %vm417_vm2, %v620_v32 }
 0x144   : > { %v644_v33 = vpop.f32.mrf.mxu0  ;;  %v647_v34 = vpop.f32.mrf.mxu1 }
 0x145   : > { %v650_v35 = vmul.f32 %v644_v33, %v2415_v16  ;;  %v651_v36 = vmul.f32 %v647_v34, %v2415_v16 }
 0x147   : > { %v652_v37 = vadd.f32 %v650_v35, %v2417_v17  ;;  %v653_v38 = vadd.f32 %v651_v36, %v2417_v17 }
 0x149   : > { %v654_v39 = vmax.f32 %v652_v37, 0.0  ;;  %v655_v40 = vmax.f32 %v653_v38, 0.0 }
 0x14b   : > { %656 = vst.msk [vmem:[#allocation2 + $0x1] sm:$0xff] %vm312_vm1, %v654_v39 }
 0x14c   : > { %657 = vst.msk [vmem:[#allocation2 + $0x9] sm:$0xff] %vm312_vm1, %v655_v40 }
 0x14d PF: > { %p1877_p8 = scmp.ge.s32.totalorder %s2131_s24, 1 }
 0x14f   : > { %661 = sbr.rel (%p1877_p8) target bundleno = 481 (0x1e1), region = 56 }
 0x154   : > { %1882 = vmatpush.msk.msra.mxu0 %vm466_vm0, %v2225_v0  ;;  %2050 = vmatpush.msk.msra.mxu1 %vm466_vm0, %v2225_v0  ;;  %v1880_v41 = vld [vmem:[%s2281_s10 + $0x80] sm:$0xff]  ;;  %v1881_v42 = vld [vmem:[%s2281_s10 + $0x88] sm:$0xff] }
 0x155   : > { %v667_v43 = vmul.f32 %v2273_v4, %v1880_v41  ;;  %v668_v44 = vmul.f32 %v2273_v4, %v1881_v42 }
 0x156   : > { %692 = vmatpush.msra.mxu0 %v2230_v1  ;;  %2051 = vmatpush.msra.mxu1 %v2230_v1 }
 0x157   : > { %v669_v45 = vadd.f32 %v2286_v5, %v667_v43  ;;  %v670_v46 = vadd.f32 %v2286_v5, %v668_v44 }
 0x158   : > { %693 = vmatpush.msra.mxu0 %v2242_v2  ;;  %2052 = vmatpush.msra.mxu1 %v2242_v2 }
 0x159   : > { %v671_v47 = vmax.f32 %v669_v45, 0.0  ;;  %v672_v0 = vmax.f32 %v670_v46, 0.0 }
 0x15a   : > { %694 = vmatpush.msra.mxu0 %v2256_v3  ;;  %2053 = vmatpush.msra.mxu1 %v2256_v3 }
 0x15b   : > { %1883 = vmatmul.msk.f32.vlgmr.msra.gmra.mxu0 %vm417_vm2, %v671_v47  ;;  %1884 = vmatmul.msk.f32.vlgmr.msra.gmra.mxu1 %vm417_vm2, %v672_v0 }
 0x1d8   : > { %v696_v4 = vpop.f32.mrf.mxu0  ;;  %v699_v1 = vpop.f32.mrf.mxu1 }
 0x1d9   : > { %v702_v48 = vmul.f32 %v696_v4, %v2415_v16  ;;  %v703_v5 = vmul.f32 %v699_v1, %v2415_v16 }
 0x1db   : > { %v704_v49 = vadd.f32 %v702_v48, %v2417_v17  ;;  %v705_v2 = vadd.f32 %v703_v5, %v2417_v17 }
 0x1dd   : > { %v706_v50 = vmax.f32 %v704_v49, 0.0  ;;  %v707_v51 = vmax.f32 %v705_v2, 0.0 }
 0x1df   : > { %709 = vst.msk [vmem:[#allocation2 + $0xd9] sm:$0xff] %vm312_vm1, %v706_v50 }
 0x1e0   : > { %710 = vst.msk [vmem:[#allocation2 + $0xe1] sm:$0xff] %vm312_vm1, %v707_v51 }
 0x1e1 PF: > { %v756_v3 = vld [vmem:[%s3194_s6 + $0x78] sm:$0xff]  ;;  %v755_v52 = vld [vmem:[%s3194_s6 + $0x70] sm:$0xff]  ;;  %v754_v16 = vld [vmem:[%s3194_s6 + $0x68] sm:$0xff]  ;;  %vm1056_vm4 = vcmask 1046528   ;;  %vm1392_vm5 = vcmask 1045504   ;;  %vm1726_vm6 = vcmask 64512  }
 0x1e2   : > { %2054 = vmatpush.msra.mxu1 %v756_v3  ;;  %2055 = vmatpush.msra.mxu2 %v756_v3  ;;  %v753_v17 = vld [vmem:[%s3194_s6 + $0x60] sm:$0xff]  ;;  %v2529_v53 = vld [vmem:[#allocation2 + $0x48] sm:$0xff]  ;;  %v2531_v54 = vld [vmem:[#allocation2 + $0x78] sm:$0xff] }
 0x1e3   : > { %2056 = vmatpush.msra.mxu3 %v756_v3  ;;  %837 = vmatpush.msra.mxu0 %v756_v3  ;;  %v768_v55 = vld [vmem:[%s3194_s6 + $0xd8] sm:$0xff]  ;;  %v2536_v56 = vld [vmem:[#allocation2 + $0xa8] sm:$0xff]  ;;  %v767_v59 = vld [vmem:[%s3194_s6 + $0xd0] sm:$0xff]  ;;  %v1072_v3 = vrot.slane %v2529_v53, 1 }
 0x1e4   : > { %2057 = vmatpush.msra.mxu1 %v755_v52  ;;  %2058 = vmatpush.msra.mxu2 %v755_v52  ;;  %v744_v57 = vld [vmem:[%s3194_s6 + $0x18] sm:$0xff]  ;;  %v743_v60 = vld [vmem:[%s3194_s6 + $0x10] sm:$0xff]  ;;  %v766_v6 = vld [vmem:[%s3194_s6 + $0xc8] sm:$0xff] }
 0x1e5   : > { %2059 = vmatpush.msra.mxu3 %v755_v52  ;;  %838 = vmatpush.msra.mxu0 %v755_v52  ;;  %v748_v58 = vld [vmem:[%s3194_s6 + $0x38] sm:$0xff]  ;;  %v747_v62 = vld [vmem:[%s3194_s6 + $0x30] sm:$0xff]  ;;  %v746_v7 = vld [vmem:[%s3194_s6 + $0x28] sm:$0xff] }
 0x1e6   : > { %2060 = vmatpush.msra.mxu1 %v754_v16  ;;  %2061 = vmatpush.msra.mxu2 %v754_v16  ;;  %v2556_v61 = vld [vmem:[#allocation2 + $0x18] sm:$0xff]  ;;  %v742_v8 = vld [vmem:[%s3194_s6 + $0x8] sm:$0xff]  ;;  %v2573_v9 = vld [vmem:[#allocation2 + $0x50] sm:$0xff] }
 0x1e7   : > { %2062 = vmatpush.msra.mxu3 %v754_v16  ;;  %839 = vmatpush.msra.mxu0 %v754_v16  ;;  %v760_v63 = vld [vmem:[%s3194_s6 + $0x98] sm:$0xff]  ;;  %v2575_v10 = vld [vmem:[#allocation2 + $0x80] sm:$0xff]  ;;  %v759_v11 = vld [vmem:[%s3194_s6 + $0x90] sm:$0xff]  ;;  %v1062_v37 = vrot.slane %v2556_v61, 1  ;;  %v1073_v52 = vrot.slane %v2573_v9, 1 }
 0x1e8   : > { %2063 = vmatpush.msra.mxu1 %v753_v17  ;;  %2064 = vmatpush.msra.mxu2 %v753_v17  ;;  %v765_v12 = vld [vmem:[%s3194_s6 + $0xc0] sm:$0xff]  ;;  %v2585_v13 = vld [vmem:[#allocation2 + $0xb0] sm:$0xff]  ;;  %v758_v19 = vld [vmem:[%s3194_s6 + $0x88] sm:$0xff] }
 0x1e9   : > { %1889 = vmatmul.msk.f32.vlgmr.msra.gmra.mxu1 %vm312_vm1, %v2529_v53  ;;  %1893 = vmatmul.msk.f32.vlgmr.msra.gmra.mxu2 %vm312_vm1, %v2531_v54  ;;  %v741_v14 = vld [vmem:[%s3194_s6] sm:$0xff]  ;;  %v752_v20 = vld [vmem:[%s3194_s6 + $0x58] sm:$0xff]  ;;  %v2621_v26 = vld [vmem:[#allocation2 + $0x90] sm:$0xff] }
 0x1ea   : > { %979 = vmatpush.msrb.mxu2 %v768_v55  ;;  %2065 = vmatpush.msra.mxu3 %v753_v17  ;;  %v745_v18 = vld [vmem:[%s3194_s6 + $0x20] sm:$0xff]  ;;  %v764_v21 = vld [vmem:[%s3194_s6 + $0xb8] sm:$0xff]  ;;  %v2633_v28 = vld [vmem:[#allocation2 + $0x30] sm:$0xff] }
 0x1eb   : > { %1897 = vmatmul.msk.f32.vlgmr.msra.gmra.mxu3 %vm312_vm1, %v2536_v56  ;;  %908 = vmatpush.msrb.mxu1 %v744_v57  ;;  %v2608_v15 = vld [vmem:[#allocation2 + $0x20] sm:$0xff]  ;;  %v772_v22 = vld [vmem:[%s3194_s6 + $0xf8] sm:$0xff]  ;;  %v2635_v29 = vld [vmem:[#allocation2 + $0x68] sm:$0xff]  ;;  %v1067_v48 = vrot.slane %v2633_v28, 1 }
 0x1ec   : > { %1141 = vmatpush.msrb.mxu3 %v748_v58  ;;  %980 = vmatpush.msrb.mxu2 %v767_v59  ;;  %v757_v23 = vld [vmem:[%s3194_s6 + $0x80] sm:$0xff]  ;;  %v776_v24 = vld [vmem:[%s3194_s6 + $0x118] sm:$0xff]  ;;  %v2641_v31 = vld [vmem:[#allocation2 + $0xc8] sm:$0xff]  ;;  %v1063_v38 = vrot.slane %v2608_v15, 1 }
 0x1ed   : > { %840 = vmatpush.msra.mxu0 %v753_v17  ;;  %909 = vmatpush.msrb.mxu1 %v743_v60  ;;  %v2619_v25 = vld [vmem:[#allocation2 + $0x60] sm:$0xff]  ;;  %v2637_v30 = vld [vmem:[#allocation2 + $0x98] sm:$0xff]  ;;  %v2649_v33 = vld [vmem:[#allocation2 + $0x8] sm:$0xff]  ;;  %v2732_v17 = vsel %vm1056_vm4, %v1072_v3, %v1073_v52 }
 0x1ee   : > { %1885 = vmatmul.msk.f32.vlgmr.msra.gmra.mxu0 %vm312_vm1, %v2556_v61  ;;  %1142 = vmatpush.msrb.mxu3 %v747_v62  ;;  %v2625_v27 = vld [vmem:[#allocation2 + $0xc0] sm:$0xff]  ;;  %v2653_v34 = vld [vmem:[#allocation2 + $0x38] sm:$0xff]  ;;  %v1058_v36 = vrot.slane %v2649_v33, 1  ;;  %v2666_v40 = vld [vmem:[#allocation2 + $0x10] sm:$0x3]  ;;  %v1064_v42 = vsel %vm1056_vm4, %v1062_v37, %v1063_v38  ;;  %v1087_v37 = vrot.slane %v2621_v26, 1 }
 0x1ef   : > { %1232 = vmatpush.msrb.mxu0 %v760_v63  ;;  %981 = vmatpush.msrb.mxu2 %v766_v6  ;;  %v2647_v32 = vld [vmem:[#allocation2] sm:$0xff]  ;;  %v751_v41 = vld [vmem:[%s3194_s6 + $0x50] sm:$0xff]  ;;  %v1060_v45 = vrot.slane %v2666_v40, 1  ;;  %v2680_v46 = vld [vmem:[#allocation2 + $0x28] sm:$0x3]  ;;  %v1068_v5 = vrot.slane %v2653_v34, 1 }
 0x1f0   : > { %1143 = vmatpush.msrb.mxu3 %v746_v7  ;;  %910 = vmatpush.msrb.mxu1 %v742_v8  ;;  %v1057_v35 = vrot.slane %v2647_v32, 1  ;;  %v763_v43 = vld [vmem:[%s3194_s6 + $0xb0] sm:$0xff]  ;;  %v1065_v47 = vrot.slane %v2680_v46, 1  ;;  %v2705_v2 = vld [vmem:[#allocation2 + $0x40] sm:$0x3]  ;;  %v750_v16 = vld [vmem:[%s3194_s6 + $0x48] sm:$0xff] }
 0x1f1   : > { %1890 = vmatmul.msk.f32.gmra.mxu1 %vm312_vm1, %v2573_v9  ;;  %1894 = vmatmul.msk.f32.gmra.mxu2 %vm312_vm1, %v2575_v10  ;;  %v771_v44 = vld [vmem:[%s3194_s6 + $0xf0] sm:$0xff]  ;;  %v1061_v0 = vsel %vm1056_vm4, %v1058_v36, %v1060_v45  ;;  %v2703_v49 = vsel %vm1056_vm4, %v1067_v48, %v1068_v5  ;;  %v1070_v50 = vrot.slane %v2705_v2, 1  ;;  %v762_v55 = vld [vmem:[%s3194_s6 + $0xa8] sm:$0xff]  ;;  %v2740_v58 = vld [vmem:[#allocation2 + $0x58] sm:$0x3]  ;;  %v1077_v63 = vrot.slane %v2619_v25, 1 }
 0x1f2   : > { %1233 = vmatpush.msrb.mxu0 %v759_v11  ;;  %982 = vmatpush.msrb.mxu2 %v765_v12  ;;  %v1059_v39 = vsel %vm1056_vm4, %v1057_v35, %v1058_v36  ;;  %v1066_v4 = vsel %vm1056_vm4, %v1063_v38, %v1065_v47  ;;  %v775_v1 = vld [vmem:[%s3194_s6 + $0x110] sm:$0xff]  ;;  %v770_v57 = vld [vmem:[%s3194_s6 + $0xe8] sm:$0xff]  ;;  %v1075_v59 = vrot.slane %v2740_v58, 1  ;;  %v1078_v6 = vrot.slane %v2635_v29, 1  ;;  %v773_v36 = vld [vmem:[%s3194_s6 + $0x100] sm:$0xff] }
 0x1f3   : > { %1898 = vmatmul.msk.f32.gmra.mxu3 %vm312_vm1, %v2585_v13  ;;  %911 = vmatpush.msrb.mxu1 %v741_v14  ;;  %v2716_v51 = vsel %vm1056_vm4, %v1068_v5, %v1070_v50  ;;  %v774_v62 = vld [vmem:[%s3194_s6 + $0x108] sm:$0xff]  ;;  %v2770_v8 = vld [vmem:[#allocation2 + $0x70] sm:$0x3]  ;;  %v1082_v14 = vrot.slane %v2531_v54, 1  ;;  %v1088_v38 = vrot.slane %v2637_v30, 1  ;;  %v3196_v45 = vrot.slane %v2608_v15, 2 }
 0x1f4   : > { %1144 = vmatpush.msrb.mxu3 %v745_v18  ;;  %1234 = vmatpush.msrb.mxu0 %v758_v19  ;;  %v2752_v60 = vsel %vm1056_vm4, %v1073_v52, %v1075_v59  ;;  %v2768_v7 = vsel %vm1056_vm4, %v1077_v63, %v1078_v6  ;;  %v1080_v11 = vrot.slane %v2770_v8, 1  ;;  %v1083_v18 = vrot.slane %v2575_v10, 1  ;;  %v749_v19 = vld [vmem:[%s3194_s6 + $0x40] sm:$0xff]  ;;  %v2874_v50 = vld [vmem:[#allocation2 + $0xb8] sm:$0x3] }
 0x1f5   : > { %1477 = vmatpush.msra.mxu2 %v752_v20  ;;  %1323 = vmatpush.msra.mxu1 %v772_v22  ;;  %v2803_v22 = vld [vmem:[#allocation2 + $0x88] sm:$0x3] }
 0x1f6   : > { %1567 = vmatpush.msra.mxu3 %v764_v21  ;;  %1886 = vmatmul.msk.f32.gmra.mxu0 %vm312_vm1, %v2608_v15  ;;  %v2782_v12 = vsel %vm1056_vm4, %v1078_v6, %v1080_v11  ;;  %v2798_v20 = vsel %vm1056_vm4, %v1082_v14, %v1083_v18  ;;  %v761_v21 = vld [vmem:[%s3194_s6 + $0xa0] sm:$0xff]  ;;  %v2898_v6 = vld [vmem:[#allocation2 + $0xd8] sm:$0xff]  ;;  %v1211_v11 = vrot.slane %v2625_v27, 1  ;;  %v1212_v14 = vrot.slane %v2641_v31, 1 }
 0x1f7   : > { %1235 = vmatpush.msrb.mxu0 %v757_v23  ;;  %1478 = vmatpush.msra.mxu2 %v751_v41  ;;  %v769_v23 = vld [vmem:[%s3194_s6 + $0xe0] sm:$0xff] }
 0x1f8   : > { %1568 = vmatpush.msra.mxu3 %v763_v43  ;;  %1324 = vmatpush.msra.mxu1 %v771_v44  ;;  %v2836_v41 = vld [vmem:[#allocation2 + $0xa0] sm:$0x3]  ;;  %v1398_v44 = vrot.slane %v2556_v61, 2 }
 0x1f9   : > { %1657 = vmatpush.msra.mxu0 %v776_v24  ;;  %1891 = vmatmul.msk.f32.gmra.mxu1 %vm312_vm1, %v2619_v25  ;;  %v1085_v24 = vrot.slane %v2803_v22, 1 }
 0x1fa   : > { %1895 = vmatmul.msk.f32.gmra.mxu2 %vm312_vm1, %v2621_v26  ;;  %1569 = vmatpush.msra.mxu3 %v762_v55 }
 0x1fb   : > { %1899 = vmatmul.msk.f32.gmra.mxu3 %vm312_vm1, %v2625_v27  ;;  %1658 = vmatpush.msra.mxu0 %v775_v1  ;;  %v2818_v35 = vsel %vm1056_vm4, %v1083_v18, %v1085_v24 }
 0x1fc   : > { %1479 = vmatpush.msra.mxu2 %v750_v16  ;;  %1325 = vmatpush.msra.mxu1 %v770_v57  ;;  %v1095_v16 = vrot.slane %v2874_v50, 1 }
 0x1fd   : > { %1659 = vmatpush.msra.mxu0 %v774_v62  ;;  %1570 = vmatpush.msra.mxu3 %v761_v21 }
 0x1fe   : > { %1887 = vmatmul.msk.f32.gmra.mxu0 %vm312_vm1, %v2633_v28  ;;  %1480 = vmatpush.msra.mxu2 %v749_v19  ;;  %v2911_v19 = vsel %vm1056_vm4, %v1211_v11, %v1212_v14 }
 0x1ff   : > { %1326 = vmatpush.msra.mxu1 %v769_v23  ;;  %1660 = vmatpush.msra.mxu0 %v773_v36  ;;  %v2915_v23 = vld [vmem:[#allocation2 + $0xd0] sm:$0x3] }
 0x200   : > { %3201 = vst [vmem:[#allocation5_spill] sm:$0xff] %v2915_v23 }
 0x201   : > { %1892 = vmatmul.msk.f32.gmra.mxu1 %vm312_vm1, %v2635_v29 }
 0x202   : > { %1896 = vmatmul.msk.f32.gmra.mxu2 %vm312_vm1, %v2637_v30 }
 0x203   : > { %1900 = vmatmul.msk.f32.gmra.mxu3 %vm312_vm1, %v2641_v31 }
 0x206   : > { %1888 = vmatmul.msk.f32.gmra.mxu0 %vm312_vm1, %v2653_v34 }
 0x209   : > { %1901 = vmatmul.msk.f32.vlgmr.msrb.gmra.mxu1 %vm312_vm1, %v2647_v32 }
 0x20a   : > { %1917 = vmatmul.msk.f32.vlgmr.msrb.gmra.mxu2 %vm312_vm1, %v2633_v28 }
 0x20b   : > { %1933 = vmatmul.msk.f32.vlgmr.msrb.gmra.mxu3 %vm312_vm1, %v1059_v39  ;;  %v2834_v39 = vsel %vm1056_vm4, %v1087_v37, %v1088_v38  ;;  %v2921_v37 = vld [vmem:[#allocation2 + $0xe0] sm:$0xff] }
 0x20e   : > { %1949 = vmatmul.msk.f32.vlgmr.msrb.gmra.mxu0 %vm312_vm1, %v1064_v42 }
 0x211   : > { %1902 = vmatmul.msk.f32.gmra.mxu1 %vm312_vm1, %v2649_v33 }
 0x212   : > { %1918 = vmatmul.msk.f32.gmra.mxu2 %vm312_vm1, %v2653_v34 }
 0x213   : > { %1934 = vmatmul.msk.f32.gmra.mxu3 %vm312_vm1, %v1061_v0  ;;  %v1092_v0 = vrot.slane %v2536_v56, 1 }
 0x216   : > { %1950 = vmatmul.msk.f32.gmra.mxu0 %vm312_vm1, %v1066_v4 }
 0x219   : > { %1903 = vmatmul.msk.f32.gmra.mxu1 %vm312_vm1, %v2556_v61  ;;  %v2865_v61 = vsel %vm1392_vm5, %v1398_v44, %v3196_v45  ;;  %v1394_v44 = vrot.slane %v2649_v33, 2  ;;  %v1404_v33 = vrot.slane %v2653_v34, 2 }
 0x21a   : > { %1919 = vmatmul.msk.f32.gmra.mxu2 %vm312_vm1, %v2529_v53 }
 0x21b   : > { %1935 = vmatmul.msk.f32.gmra.mxu3 %vm312_vm1, %v1064_v42  ;;  %v1090_v42 = vrot.slane %v2836_v41, 1 }
 0x21d   : > { %v2848_v43 = vsel %vm1056_vm4, %v1088_v38, %v1090_v42  ;;  %v1214_v38 = vrot.slane %v2915_v23, 1  ;;  %v1393_v42 = vrot.slane %v2647_v32, 2  ;;  %v1403_v32 = vrot.slane %v2633_v28, 2 }
 0x21e   : > { %1951 = vmatmul.msk.f32.gmra.mxu0 %vm312_vm1, %v2703_v49 }
 0x221   : > { %1904 = vmatmul.msk.f32.gmra.mxu1 %vm312_vm1, %v2608_v15 }
 0x222   : > { %1920 = vmatmul.msk.f32.gmra.mxu2 %vm312_vm1, %v2573_v9 }
 0x223   : > { %1936 = vmatmul.msk.f32.gmra.mxu3 %vm312_vm1, %v1066_v4  ;;  %v1093_v4 = vrot.slane %v2585_v13, 1 }
 0x225   : > { %v2870_v48 = vsel %vm1056_vm4, %v1092_v0, %v1093_v4  ;;  %v2890_v57 = vsel %vm1056_vm4, %v1093_v4, %v1095_v16  ;;  %v2935_v4 = vsel %vm1056_vm4, %v1212_v14, %v1214_v38  ;;  %v1396_v14 = vrot.slane %v2666_v40, 2 }
 0x226   : > { %1952 = vmatmul.msk.f32.gmra.mxu0 %vm312_vm1, %v2716_v51  ;;  %3203 = vst [vmem:[#allocation7_spill] sm:$0xff] %v2935_v4  ;;  %v1406_v40 = vrot.slane %v2705_v2, 2 }
 0x229   : > { %1905 = vmatmul.msk.f32.gmra.mxu1 %vm312_vm1, %v2633_v28 }
 0x22a   : > { %1921 = vmatmul.msk.f32.gmra.mxu2 %vm312_vm1, %v2619_v25 }
 0x22b   : > { %1937 = vmatmul.msk.f32.gmra.mxu3 %vm312_vm1, %v2703_v49 }
 0x22e   : > { %1953 = vmatmul.msk.f32.gmra.mxu0 %vm312_vm1, %v2732_v17 }
 0x231   : > { %1906 = vmatmul.msk.f32.gmra.mxu1 %vm312_vm1, %v2653_v34 }
 0x232   : > { %1922 = vmatmul.msk.f32.gmra.mxu2 %vm312_vm1, %v2635_v29 }
 0x233   : > { %1938 = vmatmul.msk.f32.gmra.mxu3 %vm312_vm1, %v2716_v51 }
 0x236   : > { %1954 = vmatmul.msk.f32.gmra.mxu0 %vm312_vm1, %v2752_v60 }
 0x239   : > { %1907 = vmatmul.msk.f32.gmra.mxu1 %vm312_vm1, %v2529_v53 }
 0x23a   : > { %1923 = vmatmul.msk.f32.gmra.mxu2 %vm312_vm1, %v2531_v54 }
 0x23b   : > { %1939 = vmatmul.msk.f32.gmra.mxu3 %vm312_vm1, %v2732_v17 }
 0x23e   : > { %1955 = vmatmul.msk.f32.gmra.mxu0 %vm312_vm1, %v2768_v7 }
 0x241   : > { %1908 = vmatmul.msk.f32.gmra.mxu1 %vm312_vm1, %v2573_v9 }
 0x242   : > { %1924 = vmatmul.msk.f32.gmra.mxu2 %vm312_vm1, %v2575_v10 }
 0x243   : > { %1940 = vmatmul.msk.f32.gmra.mxu3 %vm312_vm1, %v2752_v60 }
 0x246   : > { %1956 = vmatmul.msk.f32.gmra.mxu0 %vm312_vm1, %v2782_v12 }
 0x249   : > { %1909 = vmatmul.msk.f32.gmra.mxu1 %vm312_vm1, %v2619_v25 }
 0x24a   : > { %1925 = vmatmul.msk.f32.gmra.mxu2 %vm312_vm1, %v2621_v26 }
 0x24b   : > { %1941 = vmatmul.msk.f32.gmra.mxu3 %vm312_vm1, %v2768_v7 }
 0x24e   : > { %1957 = vmatmul.msk.f32.gmra.mxu0 %vm312_vm1, %v2798_v20 }
 0x251   : > { %1910 = vmatmul.msk.f32.gmra.mxu1 %vm312_vm1, %v2635_v29 }
 0x252   : > { %1926 = vmatmul.msk.f32.gmra.mxu2 %vm312_vm1, %v2637_v30 }
 0x253   : > { %1942 = vmatmul.msk.f32.gmra.mxu3 %vm312_vm1, %v2782_v12 }
 0x256   : > { %1958 = vmatmul.msk.f32.gmra.mxu0 %vm312_vm1, %v2818_v35 }
 0x259   : > { %1911 = vmatmul.msk.f32.gmra.mxu1 %vm312_vm1, %v2531_v54 }
 0x25a   : > { %1927 = vmatmul.msk.f32.gmra.mxu2 %vm312_vm1, %v2536_v56 }
 0x25b   : > { %1943 = vmatmul.msk.f32.gmra.mxu3 %vm312_vm1, %v2798_v20 }
 0x25e   : > { %1959 = vmatmul.msk.f32.gmra.mxu0 %vm312_vm1, %v2834_v39 }
 0x261   : > { %1912 = vmatmul.msk.f32.gmra.mxu1 %vm312_vm1, %v2575_v10 }
 0x262   : > { %1928 = vmatmul.msk.f32.gmra.mxu2 %vm312_vm1, %v2585_v13 }
 0x263   : > { %1944 = vmatmul.msk.f32.gmra.mxu3 %vm312_vm1, %v2818_v35 }
 0x266   : > { %v2852_v47 = vpop.f32.mrf.mxu1  ;;  %1960 = vmatmul.msk.f32.gmra.mxu0 %vm312_vm1, %v2848_v43 }
 0x269   : > { %1913 = vmatmul.msk.f32.gmra.mxu1 %vm312_vm1, %v2621_v26 }
 0x26a   : > { %1929 = vmatmul.msk.f32.gmra.mxu2 %vm312_vm1, %v2625_v27 }
 0x26b   : > { %1945 = vmatmul.msk.f32.gmra.mxu3 %vm312_vm1, %v2834_v39  ;;  %v842_v1 = vpop.f32.mrf.mxu0 }
 0x26c   : > { %v2872_v5 = vpop.f32.mrf.mxu2 }
 0x26e   : > { %v2876_v3 = vpop.f32.mrf.mxu1  ;;  %v2878_v52 = vpop.f32.mrf.mxu3  ;;  %1961 = vmatmul.msk.f32.gmra.mxu0 %vm312_vm1, %v2870_v48 }
 0x26f   : > { %3199 = vst [vmem:[#allocation3_spill] sm:$0xff] %v2878_v52  ;;  %v1397_v52 = vsel %vm1392_vm5, %v1394_v44, %v1396_v14 }
 0x271   : > { %1914 = vmatmul.msk.f32.gmra.mxu1 %vm312_vm1, %v2637_v30 }
 0x272   : > { %1930 = vmatmul.msk.f32.gmra.mxu2 %vm312_vm1, %v2641_v31 }
 0x273   : > { %1946 = vmatmul.msk.f32.gmra.mxu3 %vm312_vm1, %v2848_v43  ;;  %v845_v55 = vpop.f32.mrf.mxu0 }
 0x274   : > { %v2892_v59 = vpop.f32.mrf.mxu2 }
 0x276   : > { %v2894_v62 = vpop.f32.mrf.mxu1  ;;  %v2896_v63 = vpop.f32.mrf.mxu3  ;;  %1962 = vmatmul.msk.f32.gmra.mxu0 %vm312_vm1, %v2890_v57 }
 0x277   : > { %3200 = vst [vmem:[#allocation4_spill] sm:$0xff] %v2896_v63 }
 0x279   : > { %1915 = vmatmul.msk.f32.gmra.mxu1 %vm312_vm1, %v2536_v56 }
 0x27a   : > { %1931 = vmatmul.msk.f32.gmra.mxu2 %vm312_vm1, %v2898_v6 }
 0x27b   : > { %1947 = vmatmul.msk.f32.gmra.mxu3 %vm312_vm1, %v2870_v48  ;;  %v848_v18 = vpop.f32.mrf.mxu0 }
 0x27d   : > { %v2913_v21 = vpop.f32.mrf.mxu2 }
 0x27e   : > { %v2917_v24 = vpop.f32.mrf.mxu1  ;;  %v2919_v36 = vpop.f32.mrf.mxu3  ;;  %1963 = vmatmul.msk.f32.gmra.mxu0 %vm312_vm1, %v2911_v19 }
 0x27f   : > { %3202 = vst [vmem:[#allocation6_spill] sm:$0xff] %v2919_v36  ;;  %v1395_v36 = vsel %vm1392_vm5, %v1393_v42, %v1394_v44  ;;  %v1405_v42 = vsel %vm1392_vm5, %v1403_v32, %v1404_v33  ;;  %v1407_v44 = vsel %vm1392_vm5, %v1404_v33, %v1406_v40 }
 0x281   : > { %1916 = vmatmul.msk.f32.gmra.mxu1 %vm312_vm1, %v2585_v13 }
 0x282   : > { %1932 = vmatmul.msk.f32.gmra.mxu2 %vm312_vm1, %v2921_v37 }
 0x283   : > { %1948 = vmatmul.msk.f32.gmra.mxu3 %vm312_vm1, %v2890_v57  ;;  %v851_v0 = vpop.f32.mrf.mxu0 }
 0x285   : > { %v2937_v16 = vpop.f32.mrf.mxu2 }
 0x286   : > { %v2939_v11 = vpop.f32.mrf.mxu3  ;;  %v913_v45 = vpop.f32.mrf.mxu1  ;;  %1964 = vmatmul.msk.f32.gmra.mxu0 %vm312_vm1, %v2935_v4  ;;  %v1401_v4 = vrot.slane %v2680_v46, 2 }
 0x287   : > { %3204 = vst [vmem:[#allocation8_spill] sm:$0xff] %v2939_v11  ;;  %v914_v38 = vadd.f32 %v913_v45, %v842_v1  ;;  %v3205_v45 = vrot.slane %v2608_v15, 2 }
 0x289   : > { %1965 = vmatmul.msk.f32.vlgmr.msra.gmra.mxu1 %vm312_vm1, %v2703_v49  ;;  %v1402_v1 = vsel %vm1392_vm5, %v3205_v45, %v1401_v4  ;;  %v1408_v4 = vrot.slane %v2529_v53, 2 }
 0x28a   : > { %1981 = vmatmul.msk.f32.vlgmr.msra.gmra.mxu2 %vm312_vm1, %v1395_v36 }
 0x28b   : > { %1997 = vmatmul.msk.f32.vlgmr.msra.gmra.mxu3 %vm312_vm1, %v2865_v61  ;;  %v1237_v11 = vpop.f32.mrf.mxu0 }
 0x28d   : > { %v984_v63 = vpop.f32.mrf.mxu2 }
 0x28e   : > { %v1032_v28 = vadd.f32 %v984_v63, %v914_v38  ;;  %v916_v23 = vpop.f32.mrf.mxu1  ;;  %v1146_v34 = vpop.f32.mrf.mxu3  ;;  %2013 = vmatmul.msk.f32.vlgmr.msra.gmra.mxu0 %vm312_vm1, %v1405_v42 }
 0x28f   : > { %v917_v46 = vadd.f32 %v916_v23, %v845_v55 }
 0x290   : > { %v1194_v49 = vadd.f32 %v1146_v34, %v1032_v28 }
 0x291   : > { %1966 = vmatmul.msk.f32.gmra.mxu1 %vm312_vm1, %v2716_v51 }
 0x292   : > { %v2960_v36 = vadd.f32 %v1237_v11, %v1194_v49  ;;  %1982 = vmatmul.msk.f32.gmra.mxu2 %vm312_vm1, %v1397_v52  ;;  %v1409_v11 = vrot.slane %v2573_v9, 2  ;;  %v1411_v49 = vrot.slane %v2740_v58, 2 }
 0x293   : > { %1998 = vmatmul.msk.f32.gmra.mxu3 %vm312_vm1, %v1402_v1  ;;  %v1240_v63 = vpop.f32.mrf.mxu0 }
 0x294   : > { %v1410_v23 = vsel %vm1392_vm5, %v1408_v4, %v1409_v11 }
 0x295   : > { %v987_v32 = vpop.f32.mrf.mxu2 }
 0x296   : > { %v1033_v14 = vadd.f32 %v987_v32, %v917_v46  ;;  %v919_v2 = vpop.f32.mrf.mxu1  ;;  %v1149_v38 = vpop.f32.mrf.mxu3  ;;  %2014 = vmatmul.msk.f32.gmra.mxu0 %vm312_vm1, %v1407_v44 }
 0x297   : > { %v920_v52 = vadd.f32 %v919_v2, %v848_v18  ;;  %v1412_v18 = vsel %vm1392_vm5, %v1409_v11, %v1411_v49  ;;  %v1414_v2 = vrot.slane %v2635_v29, 2 }
 0x298   : > { %v1195_v15 = vadd.f32 %v1149_v38, %v1033_v14  ;;  %v1413_v14 = vrot.slane %v2619_v25, 2 }
 0x299   : > { %1967 = vmatmul.msk.f32.gmra.mxu1 %vm312_vm1, %v2732_v17 }
 0x29a   : > { %v2970_v51 = vadd.f32 %v1240_v63, %v1195_v15  ;;  %1983 = vmatmul.msk.f32.gmra.mxu2 %vm312_vm1, %v2865_v61  ;;  %v1415_v38 = vsel %vm1392_vm5, %v1413_v14, %v1414_v2 }
 0x29b   : > { %1999 = vmatmul.msk.f32.gmra.mxu3 %vm312_vm1, %v1405_v42  ;;  %v1243_v55 = vpop.f32.mrf.mxu0 }
 0x29d   : > { %v990_v33 = vpop.f32.mrf.mxu2 }
 0x29e   : > { %v1034_v28 = vadd.f32 %v990_v33, %v920_v52  ;;  %v922_v34 = vpop.f32.mrf.mxu1  ;;  %v1152_v53 = vpop.f32.mrf.mxu3  ;;  %2015 = vmatmul.msk.f32.gmra.mxu0 %vm312_vm1, %v1410_v23  ;;  %v1416_v52 = vrot.slane %v2770_v8, 2 }
 0x29f   : > { %v923_v17 = vadd.f32 %v922_v34, %v851_v0 }
 0x2a0   : > { %v1196_v9 = vadd.f32 %v1152_v53, %v1034_v28 }
 0x2a1   : > { %1968 = vmatmul.msk.f32.gmra.mxu1 %vm312_vm1, %v2752_v60 }
 0x2a2   : > { %v2980_v40 = vadd.f32 %v1243_v55, %v1196_v9  ;;  %1984 = vmatmul.msk.f32.gmra.mxu2 %vm312_vm1, %v1402_v1  ;;  %v1418_v9 = vrot.slane %v2531_v54, 2 }
 0x2a3   : > { %2000 = vmatmul.msk.f32.gmra.mxu3 %vm312_vm1, %v1407_v44  ;;  %v1246_v61 = vpop.f32.mrf.mxu0 }
 0x2a5   : > { %v993_v45 = vpop.f32.mrf.mxu2 }
 0x2a6   : > { %v1035_v46 = vadd.f32 %v993_v45, %v923_v17  ;;  %v925_v63 = vpop.f32.mrf.mxu1  ;;  %v1155_v32 = vpop.f32.mrf.mxu3  ;;  %2016 = vmatmul.msk.f32.gmra.mxu0 %vm312_vm1, %v1412_v18 }
 0x2a7   : > { %v926_v0 = vadd.f32 %v925_v63, %v2852_v47  ;;  %v1421_v63 = vrot.slane %v2803_v22, 2 }
 0x2a8   : > { %v1197_v58 = vadd.f32 %v1155_v32, %v1035_v46 }
 0x2a9   : > { %1969 = vmatmul.msk.f32.gmra.mxu1 %vm312_vm1, %v2768_v7 }
 0x2aa   : > { %v2990_v60 = vadd.f32 %v1246_v61, %v1197_v58  ;;  %1985 = vmatmul.msk.f32.gmra.mxu2 %vm312_vm1, %v1405_v42  ;;  %v1417_v42 = vsel %vm1392_vm5, %v1414_v2, %v1416_v52  ;;  %v1426_v52 = vrot.slane %v2836_v41, 2 }
 0x2ab   : > { %2001 = vmatmul.msk.f32.gmra.mxu3 %vm312_vm1, %v1410_v23  ;;  %v1249_v1 = vpop.f32.mrf.mxu0 }
 0x2ad   : > { %v996_v15 = vpop.f32.mrf.mxu2 }
 0x2ae   : > { %v1036_v4 = vadd.f32 %v996_v15, %v926_v0  ;;  %v928_v11 = vpop.f32.mrf.mxu1  ;;  %v1158_v25 = vpop.f32.mrf.mxu3  ;;  %2017 = vmatmul.msk.f32.gmra.mxu0 %vm312_vm1, %v1415_v38 }
 0x2af   : > { %v929_v7 = vadd.f32 %v928_v11, %v2876_v3 }
 0x2b0   : > { %v1198_v29 = vadd.f32 %v1158_v25, %v1036_v4 }
 0x2b1   : > { %1970 = vmatmul.msk.f32.gmra.mxu1 %vm312_vm1, %v2782_v12  ;;  %v1419_v12 = vrot.slane %v2575_v10, 2 }
 0x2b2   : > { %v3000_v55 = vadd.f32 %v1249_v1, %v1198_v29  ;;  %1986 = vmatmul.msk.f32.gmra.mxu2 %vm312_vm1, %v1407_v44  ;;  %v1423_v1 = vrot.slane %v2621_v26, 2 }
 0x2b3   : > { %2002 = vmatmul.msk.f32.gmra.mxu3 %vm312_vm1, %v1412_v18  ;;  %v1252_v47 = vpop.f32.mrf.mxu0  ;;  %v1420_v17 = vsel %vm1392_vm5, %v1418_v9, %v1419_v12 }
 0x2b5   : > { %v999_v33 = vpop.f32.mrf.mxu2 }
 0x2b6   : > { %v1037_v28 = vadd.f32 %v999_v33, %v929_v7  ;;  %v931_v34 = vpop.f32.mrf.mxu1  ;;  %v1161_v53 = vpop.f32.mrf.mxu3  ;;  %2018 = vmatmul.msk.f32.gmra.mxu0 %vm312_vm1, %v1417_v42  ;;  %v1303_v33 = vrot.slane %v2921_v37, 1 }
 0x2b7   : > { %v932_v3 = vadd.f32 %v931_v34, %v2894_v62 }
 0x2b8   : > { %v1199_v8 = vadd.f32 %v1161_v53, %v1037_v28 }
 0x2b9   : > { %1971 = vmatmul.msk.f32.gmra.mxu1 %vm312_vm1, %v2798_v20 }
 0x2ba   : > { %v3011_v49 = vadd.f32 %v1252_v47, %v1199_v8  ;;  %1987 = vmatmul.msk.f32.gmra.mxu2 %vm312_vm1, %v1410_v23  ;;  %v1422_v23 = vsel %vm1392_vm5, %v1419_v12, %v1421_v63  ;;  %v1302_v47 = vrot.slane %v2898_v6, 1 }
 0x2bb   : > { %2003 = vmatmul.msk.f32.gmra.mxu3 %vm312_vm1, %v1415_v38  ;;  %v1255_v44 = vpop.f32.mrf.mxu0 }
 0x2bc   : > { %v1304_v8 = vsel %vm1056_vm4, %v1302_v47, %v1303_v33 }
 0x2bd   : > { %v1002_v61 = vpop.f32.mrf.mxu2 }
 0x2be   : > { %v1038_v45 = vadd.f32 %v1002_v61, %v932_v3  ;;  %v934_v46 = vpop.f32.mrf.mxu1  ;;  %v1164_v54 = vpop.f32.mrf.mxu3  ;;  %2019 = vmatmul.msk.f32.gmra.mxu0 %vm312_vm1, %v1420_v17  ;;  %v1636_v61 = vrot.slane %v2898_v6, 2 }
 0x2bf   : > { %v935_v20 = vadd.f32 %v934_v46, %v2917_v24 }
 0x2c0   : > { %v1200_v10 = vadd.f32 %v1164_v54, %v1038_v45  ;;  %v1637_v45 = vrot.slane %v2921_v37, 2 }
 0x2c1   : > { %1972 = vmatmul.msk.f32.gmra.mxu1 %vm312_vm1, %v2818_v35  ;;  %v1424_v35 = vrot.slane %v2637_v30, 2 }
 0x2c2   : > { %v3021_v32 = vadd.f32 %v1255_v44, %v1200_v10  ;;  %1988 = vmatmul.msk.f32.gmra.mxu2 %vm312_vm1, %v1412_v18  ;;  %v1638_v6 = vsel %vm1392_vm5, %v1636_v61, %v1637_v45 }
 0x2c3   : > { %2004 = vmatmul.msk.f32.gmra.mxu3 %vm312_vm1, %v1417_v42  ;;  %v1258_v62 = vpop.f32.mrf.mxu0  ;;  %v1425_v4 = vsel %vm1392_vm5, %v1423_v1, %v1424_v35 }
 0x2c5   : > { %v1005_v58 = vpop.f32.mrf.mxu2 }
 0x2c6   : > { %v1039_v14 = vadd.f32 %v1005_v58, %v935_v20  ;;  %v937_v2 = vpop.f32.mrf.mxu1  ;;  %v1167_v0 = vpop.f32.mrf.mxu3  ;;  %2020 = vmatmul.msk.f32.gmra.mxu0 %vm312_vm1, %v1422_v23 }
 0x2c7   : > { %v938_v24 = vadd.f32 %v937_v2, %v2872_v5  ;;  %v1547_v2 = vrot.slane %v2641_v31, 2 }
 0x2c8   : > { %v1201_v22 = vadd.f32 %v1167_v0, %v1039_v14 }
 0x2c9   : > { %1973 = vmatmul.msk.f32.gmra.mxu1 %vm312_vm1, %v2834_v39 }
 0x2ca   : > { %v3032_v15 = vadd.f32 %v1258_v62, %v1201_v22  ;;  %1989 = vmatmul.msk.f32.gmra.mxu2 %vm312_vm1, %v1415_v38  ;;  %v1427_v38 = vsel %vm1392_vm5, %v1424_v35, %v1426_v52 }
 0x2cb   : > { %2005 = vmatmul.msk.f32.gmra.mxu3 %vm312_vm1, %v1420_v17  ;;  %v1261_v18 = vpop.f32.mrf.mxu0 }
 0x2cd   : > { %v1008_v11 = vpop.f32.mrf.mxu2 }
 0x2ce   : > { %v1040_v25 = vadd.f32 %v1008_v11, %v938_v24  ;;  %v940_v29 = vpop.f32.mrf.mxu1  ;;  %v1170_v26 = vpop.f32.mrf.mxu3  ;;  %2021 = vmatmul.msk.f32.gmra.mxu0 %vm312_vm1, %v1425_v4 }
 0x2cf   : > { %v941_v39 = vadd.f32 %v940_v29, %v2892_v59  ;;  %v1429_v59 = vrot.slane %v2585_v13, 2 }
 0x2d0   : > { %v1202_v30 = vadd.f32 %v1170_v26, %v1040_v25  ;;  %v3207_v25 = vld [vmem:[#allocation5_spill] sm:$0xff] }
 0x2d1   : > { %1974 = vmatmul.msk.f32.gmra.mxu1 %vm312_vm1, %v2848_v43  ;;  %v1549_v29 = vrot.slane %v3207_v25, 2 }
 0x2d2   : > { %v3042_v7 = vadd.f32 %v1261_v18, %v1202_v30  ;;  %1990 = vmatmul.msk.f32.gmra.mxu2 %vm312_vm1, %v1417_v42  ;;  %v1428_v42 = vrot.slane %v2536_v56, 2 }
 0x2d3   : > { %2006 = vmatmul.msk.f32.gmra.mxu3 %vm312_vm1, %v1422_v23  ;;  %v1264_v5 = vpop.f32.mrf.mxu0 }
 0x2d4   : > { %v1430_v56 = vsel %vm1392_vm5, %v1428_v42, %v1429_v59  ;;  %v3210_v42 = vld [vmem:[#allocation6_spill] sm:$0xff] }
 0x2d5   : > { %v1011_v28 = vpop.f32.mrf.mxu2 }
 0x2d6   : > { %v1041_v41 = vadd.f32 %v1011_v28, %v941_v39  ;;  %v943_v34 = vpop.f32.mrf.mxu1  ;;  %v1173_v53 = vpop.f32.mrf.mxu3  ;;  %2022 = vmatmul.msk.f32.gmra.mxu0 %vm312_vm1, %v1427_v38  ;;  %v1550_v39 = vsel %vm1392_vm5, %v1547_v2, %v1549_v29 }
 0x2d7   : > { %v944_v12 = vadd.f32 %v943_v34, %v2913_v21 }
 0x2d8   : > { %v1203_v43 = vadd.f32 %v1173_v53, %v1041_v41  ;;  %v740_v53 = vld [vmem:[#allocation2 + $0xe8] sm:$0x3] }
 0x2d9   : > { %1975 = vmatmul.msk.f32.gmra.mxu1 %vm312_vm1, %v2870_v48 }
 0x2da   : > { %v3058_v9 = vadd.f32 %v1264_v5, %v1203_v43  ;;  %1991 = vmatmul.msk.f32.gmra.mxu2 %vm312_vm1, %v1420_v17  ;;  %v1431_v17 = vrot.slane %v2874_v50, 2 }
 0x2db   : > { %2007 = vmatmul.msk.f32.gmra.mxu3 %vm312_vm1, %v1425_v4  ;;  %v1267_v3 = vpop.f32.mrf.mxu0 }
 0x2dc   : > { %v1432_v20 = vsel %vm1392_vm5, %v1429_v59, %v1431_v17 }
 0x2dd   : > { %v1014_v44 = vpop.f32.mrf.mxu2 }
 0x2de   : > { %v1042_v13 = vadd.f32 %v1014_v44, %v944_v12  ;;  %v946_v46 = vpop.f32.mrf.mxu1  ;;  %v1176_v54 = vpop.f32.mrf.mxu3  ;;  %2023 = vmatmul.msk.f32.gmra.mxu0 %vm312_vm1, %v1430_v56 }
 0x2df   : > { %v947_v21 = vadd.f32 %v946_v46, %v2937_v16  ;;  %v3206_v16 = vld [vmem:[#allocation3_spill] sm:$0xff] }
 0x2e0   : > { %v1204_v48 = vadd.f32 %v1176_v54, %v1042_v13 }
 0x2e1   : > { %1976 = vmatmul.msk.f32.gmra.mxu1 %vm312_vm1, %v2890_v57 }
 0x2e2   : > { %v3070_v10 = vadd.f32 %v1267_v3, %v1204_v48  ;;  %1992 = vmatmul.msk.f32.gmra.mxu2 %vm312_vm1, %v1422_v23  ;;  %v1546_v23 = vrot.slane %v2625_v27, 2 }
 0x2e3   : > { %2008 = vmatmul.msk.f32.gmra.mxu3 %vm312_vm1, %v1427_v38  ;;  %v1270_v63 = vpop.f32.mrf.mxu0 }
 0x2e4   : > { %v1548_v35 = vsel %vm1392_vm5, %v1546_v23, %v1547_v2 }
 0x2e5   : > { %v1017_v62 = vpop.f32.mrf.mxu2 }
 0x2e6   : > { %v1043_v50 = vadd.f32 %v1017_v62, %v947_v21  ;;  %v949_v58 = vpop.f32.mrf.mxu1  ;;  %v1179_v14 = vpop.f32.mrf.mxu3  ;;  %2024 = vmatmul.msk.f32.gmra.mxu0 %vm312_vm1, %v1432_v20 }
 0x2e7   : > { %v950_v22 = vadd.f32 %v949_v58, %v3206_v16 }
 0x2e8   : > { %v1205_v57 = vadd.f32 %v1179_v14, %v1043_v50 }
 0x2e9   : > { %1977 = vmatmul.msk.f32.gmra.mxu1 %vm312_vm1, %v2911_v19  ;;  %v3208_v19 = vld [vmem:[#allocation7_spill] sm:$0xff] }
 0x2ea   : > { %v3084_v0 = vadd.f32 %v1270_v63, %v1205_v57  ;;  %1993 = vmatmul.msk.f32.gmra.mxu2 %vm312_vm1, %v1425_v4  ;;  %v3209_v4 = vld [vmem:[#allocation4_spill] sm:$0xff] }
 0x2eb   : > { %2009 = vmatmul.msk.f32.gmra.mxu3 %vm312_vm1, %v1430_v56  ;;  %v1273_v1 = vpop.f32.mrf.mxu0 }
 0x2ed   : > { %v1020_v24 = vpop.f32.mrf.mxu2 }
 0x2ee   : > { %v1044_v18 = vadd.f32 %v1020_v24, %v950_v22  ;;  %v952_v11 = vpop.f32.mrf.mxu1  ;;  %v1182_v27 = vpop.f32.mrf.mxu3  ;;  %2025 = vmatmul.msk.f32.gmra.mxu0 %vm312_vm1, %v1548_v35 }
 0x2ef   : > { %v953_v30 = vadd.f32 %v952_v11, %v3209_v4 }
 0x2f0   : > { %v1206_v31 = vadd.f32 %v1182_v27, %v1044_v18 }
 0x2f1   : > { %1978 = vmatmul.msk.f32.gmra.mxu1 %vm312_vm1, %v3208_v19 }
 0x2f2   : > { %v3094_v26 = vadd.f32 %v1273_v1, %v1206_v31  ;;  %1994 = vmatmul.msk.f32.gmra.mxu2 %vm312_vm1, %v1427_v38  ;;  %v1305_v38 = vrot.slane %v740_v53, 1 }
 0x2f3   : > { %2010 = vmatmul.msk.f32.gmra.mxu3 %vm312_vm1, %v1432_v20  ;;  %v1276_v52 = vpop.f32.mrf.mxu0 }
 0x2f4   : > { %v1306_v46 = vsel %vm1056_vm4, %v1303_v33, %v1305_v38 }
 0x2f5   : > { %v1023_v5 = vpop.f32.mrf.mxu2 }
 0x2f6   : > { %v1045_v47 = vadd.f32 %v1023_v5, %v953_v30  ;;  %v955_v28 = vpop.f32.mrf.mxu1  ;;  %v1185_v41 = vpop.f32.mrf.mxu3  ;;  %2026 = vmatmul.msk.f32.gmra.mxu0 %vm312_vm1, %v1550_v39 }
 0x2f7   : > { %v956_v59 = vadd.f32 %v955_v28, %v3210_v42 }
 0x2f8   : > { %v1207_v34 = vadd.f32 %v1185_v41, %v1045_v47 }
 0x2f9   : > { %1979 = vmatmul.msk.f32.gmra.mxu1 %vm312_vm1, %v1304_v8  ;;  %v1639_v8 = vrot.slane %v740_v53, 2 }
 0x2fa   : > { %v3103_v43 = vadd.f32 %v1276_v52, %v1207_v34  ;;  %1995 = vmatmul.msk.f32.gmra.mxu2 %vm312_vm1, %v1430_v56  ;;  %v3211_v56 = vld [vmem:[#allocation8_spill] sm:$0xff] }
 0x2fb   : > { %2011 = vmatmul.msk.f32.gmra.mxu3 %vm312_vm1, %v1548_v35  ;;  %v1279_v12 = vpop.f32.mrf.mxu0  ;;  %v1640_v63 = vsel %vm1392_vm5, %v1637_v45, %v1639_v8 }
 0x2fd   : > { %v1026_v3 = vpop.f32.mrf.mxu2 }
 0x2fe   : > { %v1046_v44 = vadd.f32 %v1026_v3, %v956_v59  ;;  %v958_v13 = vpop.f32.mrf.mxu1  ;;  %v1188_v61 = vpop.f32.mrf.mxu3  ;;  %2027 = vmatmul.msk.f32.gmra.mxu0 %vm312_vm1, %v1638_v6 }
 0x2ff   : > { %v959_v17 = vadd.f32 %v958_v13, %v3211_v56 }
 0x300   : > { %v1208_v54 = vadd.f32 %v1188_v61, %v1046_v44 }
 0x301   : > { %1980 = vmatmul.msk.f32.gmra.mxu1 %vm312_vm1, %v1306_v46 }
 0x302   : > { %v3113_v48 = vadd.f32 %v1279_v12, %v1208_v54  ;;  %1996 = vmatmul.msk.f32.gmra.mxu2 %vm312_vm1, %v1432_v20 }
 0x303   : > { %2012 = vmatmul.msk.f32.gmra.mxu3 %vm312_vm1, %v1550_v39  ;;  %v1282_v21 = vpop.f32.mrf.mxu0 }
 0x305   : > { %v1029_v33 = vpop.f32.mrf.mxu2 }
 0x306   : > { %v1047_v62 = vadd.f32 %v1029_v33, %v959_v17  ;;  %v1191_v6 = vpop.f32.mrf.mxu3  ;;  %v1328_v50 = vpop.f32.mrf.mxu1  ;;  %2028 = vmatmul.msk.f32.gmra.mxu0 %vm312_vm1, %v1640_v63 }
 0x307   : > { %v1376_v20 = vadd.f32 %v1328_v50, %v2960_v36 }
 0x308   : > { %v1209_v58 = vadd.f32 %v1191_v6, %v1047_v62 }
 0x30a   : > { %v3123_v14 = vadd.f32 %v1282_v21, %v1209_v58 }
 0x30b   : > { %v1662_v57 = vpop.f32.mrf.mxu0 }
 0x30d   : > { %v1482_v23 = vpop.f32.mrf.mxu2 }
 0x30e   : > { %v1530_v2 = vadd.f32 %v1482_v23, %v1376_v20  ;;  %v1331_v16 = vpop.f32.mrf.mxu1  ;;  %v1572_v37 = vpop.f32.mrf.mxu3 }
 0x30f   : > { %v1377_v1 = vadd.f32 %v1331_v16, %v2970_v51 }
 0x310   : > { %v1620_v22 = vadd.f32 %v1572_v37, %v1530_v2 }
 0x312   : > { %v1710_v45 = vadd.f32 %v1662_v57, %v1620_v22 }
 0x313   : > { %v1665_v35 = vpop.f32.mrf.mxu0 }
 0x314   : > { %1727 = vst.msk [vmem:[%s2310_s18] sm:$0xff] %vm1726_vm6, %v1710_v45 }
 0x315   : > { %v1485_v24 = vpop.f32.mrf.mxu2 }
 0x316   : > { %v1531_v18 = vadd.f32 %v1485_v24, %v1377_v1  ;;  %v1334_v11 = vpop.f32.mrf.mxu1  ;;  %v1575_v27 = vpop.f32.mrf.mxu3 }
 0x317   : > { %v1378_v25 = vadd.f32 %v1334_v11, %v2980_v40 }
 0x318   : > { %v1621_v36 = vadd.f32 %v1575_v27, %v1531_v18 }
 0x31a   : > { %v1711_v31 = vadd.f32 %v1665_v35, %v1621_v36 }
 0x31b   : > { %v1668_v29 = vpop.f32.mrf.mxu0 }
 0x31c   : > { %1728 = vst.msk [vmem:[%s2310_s18 + $0x8] sm:$0xff] %vm1726_vm6, %v1711_v31 }
 0x31d   : > { %v1488_v19 = vpop.f32.mrf.mxu2 }
 0x31e   : > { %v1532_v4 = vadd.f32 %v1488_v19, %v1378_v25  ;;  %v1337_v30 = vpop.f32.mrf.mxu1  ;;  %v1578_v51 = vpop.f32.mrf.mxu3 }
 0x31f   : > { %v1379_v5 = vadd.f32 %v1337_v30, %v2990_v60 }
 0x320   : > { %v1622_v52 = vadd.f32 %v1578_v51, %v1532_v4 }
 0x322   : > { %v1712_v39 = vadd.f32 %v1668_v29, %v1622_v52 }
 0x323   : > { %v1671_v47 = vpop.f32.mrf.mxu0 }
 0x324   : > { %1729 = vst.msk [vmem:[%s2310_s18 + $0x10] sm:$0xff] %vm1726_vm6, %v1712_v39 }
 0x325   : > { %v1491_v28 = vpop.f32.mrf.mxu2 }
 0x326   : > { %v1533_v41 = vadd.f32 %v1491_v28, %v1379_v5  ;;  %v1340_v34 = vpop.f32.mrf.mxu1  ;;  %v1581_v40 = vpop.f32.mrf.mxu3 }
 0x327   : > { %v1380_v42 = vadd.f32 %v1340_v34, %v3000_v55 }
 0x328   : > { %v1623_v53 = vadd.f32 %v1581_v40, %v1533_v41 }
 0x32a   : > { %v1713_v38 = vadd.f32 %v1671_v47, %v1623_v53 }
 0x32b   : > { %v1674_v59 = vpop.f32.mrf.mxu0 }
 0x32c   : > { %1730 = vst.msk [vmem:[%s2310_s18 + $0x18] sm:$0xff] %vm1726_vm6, %v1713_v38 }
 0x32d   : > { %v1494_v12 = vpop.f32.mrf.mxu2 }
 0x32e   : > { %v1534_v3 = vadd.f32 %v1494_v12, %v1380_v42  ;;  %v1343_v44 = vpop.f32.mrf.mxu1  ;;  %v1584_v60 = vpop.f32.mrf.mxu3 }
 0x32f   : > { %v1381_v46 = vadd.f32 %v1343_v44, %v3011_v49 }
 0x330   : > { %v1624_v13 = vadd.f32 %v1584_v60, %v1534_v3 }
 0x332   : > { %v1714_v61 = vadd.f32 %v1674_v59, %v1624_v13 }
 0x333   : > { %v1677_v54 = vpop.f32.mrf.mxu0 }
 0x334   : > { %1731 = vst.msk [vmem:[%s2310_s18 + $0x20] sm:$0xff] %vm1726_vm6, %v1714_v61 }
 0x335   : > { %v1497_v8 = vpop.f32.mrf.mxu2 }
 0x336   : > { %v1535_v56 = vadd.f32 %v1497_v8, %v1381_v46  ;;  %v1346_v17 = vpop.f32.mrf.mxu1  ;;  %v1587_v55 = vpop.f32.mrf.mxu3 }
 0x337   : > { %v1382_v33 = vadd.f32 %v1346_v17, %v3021_v32 }
 0x338   : > { %v1625_v21 = vadd.f32 %v1587_v55, %v1535_v56 }
 0x33a   : > { %v1715_v63 = vadd.f32 %v1677_v54, %v1625_v21 }
 0x33b   : > { %v1680_v62 = vpop.f32.mrf.mxu0 }
 0x33c   : > { %1732 = vst.msk [vmem:[%s2310_s18 + $0x28] sm:$0xff] %vm1726_vm6, %v1715_v63 }
 0x33d   : > { %v1500_v6 = vpop.f32.mrf.mxu2 }
 0x33e   : > { %v1536_v50 = vadd.f32 %v1500_v6, %v1382_v33  ;;  %v1349_v58 = vpop.f32.mrf.mxu1  ;;  %v1590_v49 = vpop.f32.mrf.mxu3 }
 0x33f   : > { %v1383_v23 = vadd.f32 %v1349_v58, %v3032_v15 }
 0x340   : > { %v1626_v20 = vadd.f32 %v1590_v49, %v1536_v50 }
 0x342   : > { %v1716_v57 = vadd.f32 %v1680_v62, %v1626_v20 }
 0x343   : > { %v1683_v2 = vpop.f32.mrf.mxu0 }
 0x344   : > { %1733 = vst.msk [vmem:[%s2310_s18 + $0x30] sm:$0xff] %vm1726_vm6, %v1716_v57 }
 0x345   : > { %v1503_v16 = vpop.f32.mrf.mxu2 }
 0x346   : > { %v1537_v37 = vadd.f32 %v1503_v16, %v1383_v23  ;;  %v1352_v22 = vpop.f32.mrf.mxu1  ;;  %v1593_v32 = vpop.f32.mrf.mxu3 }
 0x347   : > { %v1384_v35 = vadd.f32 %v1352_v22, %v3042_v7 }
 0x348   : > { %v1627_v45 = vadd.f32 %v1593_v32, %v1537_v37 }
 0x34a   : > { %v1717_v1 = vadd.f32 %v1683_v2, %v1627_v45 }
 0x34b   : > { %v1686_v24 = vpop.f32.mrf.mxu0 }
 0x34c   : > { %1734 = vst.msk [vmem:[%s2310_s18 + $0x38] sm:$0xff] %vm1726_vm6, %v1717_v1 }
 0x34d   : > { %v1506_v18 = vpop.f32.mrf.mxu2 }
 0x34e   : > { %v1538_v11 = vadd.f32 %v1506_v18, %v1384_v35  ;;  %v1355_v27 = vpop.f32.mrf.mxu1  ;;  %v1596_v15 = vpop.f32.mrf.mxu3 }
 0x34f   : > { %v1385_v25 = vadd.f32 %v1355_v27, %v3058_v9 }
 0x350   : > { %v1628_v36 = vadd.f32 %v1596_v15, %v1538_v11 }
 0x352   : > { %v1718_v31 = vadd.f32 %v1686_v24, %v1628_v36 }
 0x353   : > { %v1689_v29 = vpop.f32.mrf.mxu0 }
 0x354   : > { %1735 = vst.msk [vmem:[%s2310_s18 + $0x40] sm:$0xff] %vm1726_vm6, %v1718_v31 }
 0x355   : > { %v1509_v19 = vpop.f32.mrf.mxu2 }
 0x356   : > { %v1539_v4 = vadd.f32 %v1509_v19, %v1385_v25  ;;  %v1358_v30 = vpop.f32.mrf.mxu1  ;;  %v1599_v7 = vpop.f32.mrf.mxu3 }
 0x357   : > { %v1386_v39 = vadd.f32 %v1358_v30, %v3070_v10 }
 0x358   : > { %v1629_v51 = vadd.f32 %v1599_v7, %v1539_v4 }
 0x35a   : > { %v1719_v52 = vadd.f32 %v1689_v29, %v1629_v51 }
 0x35b   : > { %v1692_v5 = vpop.f32.mrf.mxu0 }
 0x35c   : > { %1736 = vst.msk [vmem:[%s2310_s18 + $0x48] sm:$0xff] %vm1726_vm6, %v1719_v52 }
 0x35d   : > { %v1512_v47 = vpop.f32.mrf.mxu2 }
 0x35e   : > { %v1540_v28 = vadd.f32 %v1512_v47, %v1386_v39  ;;  %v1361_v41 = vpop.f32.mrf.mxu1  ;;  %v1602_v9 = vpop.f32.mrf.mxu3 }
 0x35f   : > { %v1387_v53 = vadd.f32 %v1361_v41, %v3084_v0 }
 0x360   : > { %v1630_v34 = vadd.f32 %v1602_v9, %v1540_v28 }
 0x362   : > { %v1720_v40 = vadd.f32 %v1692_v5, %v1630_v34 }
 0x363   : > { %v1695_v38 = vpop.f32.mrf.mxu0 }
 0x364   : > { %1737 = vst.msk [vmem:[%s2310_s18 + $0x50] sm:$0xff] %vm1726_vm6, %v1720_v40 }
 0x365   : > { %v1515_v42 = vpop.f32.mrf.mxu2 }
 0x366   : > { %v1541_v59 = vadd.f32 %v1515_v42, %v1387_v53  ;;  %v1364_v12 = vpop.f32.mrf.mxu1  ;;  %v1605_v10 = vpop.f32.mrf.mxu3 }
 0x367   : > { %v1388_v60 = vadd.f32 %v1364_v12, %v3094_v26 }
 0x368   : > { %v1631_v3 = vadd.f32 %v1605_v10, %v1541_v59 }
 0x36a   : > { %v1721_v44 = vadd.f32 %v1695_v38, %v1631_v3 }
 0x36b   : > { %v1698_v13 = vpop.f32.mrf.mxu0 }
 0x36c   : > { %1738 = vst.msk [vmem:[%s2310_s18 + $0x58] sm:$0xff] %vm1726_vm6, %v1721_v44 }
 0x36d   : > { %v1518_v61 = vpop.f32.mrf.mxu2 }
 0x36e   : > { %v1542_v46 = vadd.f32 %v1518_v61, %v1388_v60  ;;  %v1367_v54 = vpop.f32.mrf.mxu1  ;;  %v1608_v0 = vpop.f32.mrf.mxu3 }
 0x36f   : > { %v1389_v17 = vadd.f32 %v1367_v54, %v3103_v43 }
 0x370   : > { %v1632_v8 = vadd.f32 %v1608_v0, %v1542_v46 }
 0x372   : > { %v1722_v56 = vadd.f32 %v1698_v13, %v1632_v8 }
 0x373   : > { %v1701_v55 = vpop.f32.mrf.mxu0 }
 0x374   : > { %1739 = vst.msk [vmem:[%s2310_s18 + $0x60] sm:$0xff] %vm1726_vm6, %v1722_v56 }
 0x375   : > { %v1521_v21 = vpop.f32.mrf.mxu2 }
 0x376   : > { %v1543_v63 = vadd.f32 %v1521_v21, %v1389_v17  ;;  %v1370_v33 = vpop.f32.mrf.mxu1  ;;  %v1611_v26 = vpop.f32.mrf.mxu3 }
 0x377   : > { %v1390_v50 = vadd.f32 %v1370_v33, %v3113_v48 }
 0x378   : > { %v1633_v62 = vadd.f32 %v1611_v26, %v1543_v63 }
 0x37a   : > { %v1723_v6 = vadd.f32 %v1701_v55, %v1633_v62 }
 0x37b   : > { %v1704_v49 = vpop.f32.mrf.mxu0 }
 0x37c   : > { %1740 = vst.msk [vmem:[%s2310_s18 + $0x68] sm:$0xff] %vm1726_vm6, %v1723_v6 }
 0x37d   : > { %v1524_v58 = vpop.f32.mrf.mxu2 }
 0x37e   : > { %v1544_v20 = vadd.f32 %v1524_v58, %v1390_v50  ;;  %v1614_v57 = vpop.f32.mrf.mxu3  ;;  %v1373_v23 = vpop.f32.mrf.mxu1 }
 0x37f   : > { %v1391_v16 = vadd.f32 %v1373_v23, %v3123_v14 }
 0x380   : > { %v1634_v43 = vadd.f32 %v1614_v57, %v1544_v20 }
 0x382   : > { %v1724_v2 = vadd.f32 %v1704_v49, %v1634_v43 }
 0x383   : > { %v1707_v45 = vpop.f32.mrf.mxu0 }
 0x384   : > { %1741 = vst.msk [vmem:[%s2310_s18 + $0x70] sm:$0xff] %vm1726_vm6, %v1724_v2 }
 0x385   : > { %v1527_v37 = vpop.f32.mrf.mxu2 }
 0x386   : > { %v1545_v22 = vadd.f32 %v1527_v37, %v1391_v16  ;;  %v1617_v32 = vpop.f32.mrf.mxu3 }
 0x388   : > { %v1635_v1 = vadd.f32 %v1617_v32, %v1545_v22 }
 0x38a   : > { %v1725_v48 = vadd.f32 %v1707_v45, %v1635_v1 }
 0x38c   : > { %1742 = vst.msk [vmem:[%s2310_s18 + $0x78] sm:$0xff] %vm1726_vm6, %v1725_v48 }
 0x38d PF: > { %s17_s28 = sadd.s32 1, %s2147_s28   ;;  %s3212_s24 = smov %s2139_s26 }
 0x38e   : > { %p14_p9 = scmp.ge.s32.totalorder %s17_s28, 6   ;;  %s3213_s25 = smov %s2143_s27 }
 0x38f   : > { %s3214_s26 = smov %s3217_s29  ;;  %s3215_s27 = smov %s3221_s30 }
 0x390   :  { %16 = sbr.rel (!%p14_p9) target bundleno = 3 (0x3), region = 91 }

</bundles_post_ra>
